<compile_context>
chip_gen: v7x
topology: tpu7x:2x2x1
jax: 0.10.0
libtpu: 0.0.40
codegen_flags: <defaults>
</compile_context>

<pallas_src>
import functools
import math

import jax
import jax.numpy as jnp
from jax import lax
from jax.experimental import pallas as pl
from jax.experimental.pallas import tpu as pltpu


def _attention_layer_kernel(
    x_ref,      # (Bt, S, H)  hidden_states block (f32)
    mask_ref,   # (Bt, 1, S)  attention_mask (1.0 = keep, 0.0 = masked)
    wq_ref, bq_ref,    # (H, H) bf16, (1, H) f32
    wk_ref, bk_ref,
    wv_ref, bv_ref,
    wo_ref, bo_ref,
    gamma_ref, beta_ref,   # (1, H) f32 each
    out_ref,    # (Bt, S, H)
    *,
    num_heads: int,
    head_size: int,
    layer_norm_eps: float,
    kv_tile: int,
):
    Bt, S, H = x_ref.shape
    d = head_size
    n_kv = max(S // kv_tile, 1)
    inv_sqrt_d = 1.0 / math.sqrt(d)

    x = x_ref[...]                         # (Bt, S, H) f32
    x2 = x.reshape(Bt * S, H)              # (M, H), layout-preserving flatten
    xb = x2.astype(jnp.bfloat16)

    # ---- QKV projections: bf16 MXU operands, f32 accumulation, f32 bias add ----
    # 1/sqrt(d) folded into q once (O(M*H)) instead of scaling O(nh*S*S) scores.
    q = jnp.dot(xb, wq_ref[...], preferred_element_type=jnp.float32) + bq_ref[0]
    qb = (q * inv_sqrt_d).astype(jnp.bfloat16)
    kb = (jnp.dot(xb, wk_ref[...], preferred_element_type=jnp.float32)
          + bk_ref[0]).astype(jnp.bfloat16)
    vb = (jnp.dot(xb, wv_ref[...], preferred_element_type=jnp.float32)
          + bv_ref[0]).astype(jnp.bfloat16)

    # Additive attention mask, computed once: (Bt, 1, S).
    am_all = (1.0 - mask_ref[...]) * (-10000.0)

    # dot_general contracting on the last (head) dim of both operands:
    # q (S, d) x k (tk, d) -> (S, tk); no explicit transposes in-kernel.
    contract_last = (((1,), (1,)), ((), ()))

    row_ctx = []
    for b in range(Bt):
        rs = slice(b * S, (b + 1) * S)
        am = am_all[b]                                   # (1, S) f32
        head_ctx = []
        for h in range(num_heads):
            hs = slice(h * d, (h + 1) * d)
            q_h = qb[rs, hs]                             # (S, d) bf16 (pre-scaled)
            k_h = kb[rs, hs]                             # (S, d) bf16
            v_h = vb[rs, hs]                             # (S, d) bf16

            if n_kv <= 1:
                # Single-shot softmax (short sequences): (S, S) scores per head.
                s = lax.dot_general(q_h, k_h, contract_last,
                                    preferred_element_type=jnp.float32)
                s = s + am
                s = s - jnp.max(s, axis=-1, keepdims=True)
                p = jnp.exp(s)
                inv_l = pl.reciprocal(jnp.sum(p, axis=-1, keepdims=True),
                                      approx=True)
                ctx_h = jnp.dot(p.astype(jnp.bfloat16), v_h,
                                preferred_element_type=jnp.float32) * inv_l
            else:
                # Flash-style key-tiled online softmax: O(S * kv_tile) live scores.
                m_i = jnp.full((S, 1), -1e30, jnp.float32)
                l_i = jnp.zeros((S, 1), jnp.float32)
                acc = jnp.zeros((S, d), jnp.float32)
                for kt in range(n_kv):
                    ks = slice(kt * kv_tile, (kt + 1) * kv_tile)
                    s = lax.dot_general(q_h, k_h[ks], contract_last,
                                        preferred_element_type=jnp.float32)
                    s = s + am[:, ks]
                    m_new = jnp.maximum(m_i, jnp.max(s, axis=-1, keepdims=True))
                    alpha = jnp.exp(m_i - m_new)
                    p = jnp.exp(s - m_new)
                    l_i = alpha * l_i + jnp.sum(p, axis=-1, keepdims=True)
                    acc = alpha * acc + jnp.dot(p.astype(jnp.bfloat16), v_h[ks],
                                                preferred_element_type=jnp.float32)
                    m_i = m_new
                ctx_h = acc * pl.reciprocal(l_i, approx=True)

            head_ctx.append(ctx_h.astype(jnp.bfloat16))

        # Lane-dense merge of all heads for this batch row: (S, H) bf16.
        # NOTE: correct because num_heads * head_size == H (asserted in wrapper).
        row_ctx.append(jnp.concatenate(head_ctx, axis=-1))

    ctx = jnp.concatenate(row_ctx, axis=0) if Bt > 1 else row_ctx[0]   # (M, H) bf16

    # ---- SelfOutput: dense (bf16 MXU) + residual + LayerNorm (f32) ----
    y = jnp.dot(ctx, wo_ref[...], preferred_element_type=jnp.float32) + bo_ref[0]
    y = y + x2                                            # residual

    mean = jnp.mean(y, axis=-1, keepdims=True)
    centered = y - mean
    var = jnp.mean(centered * centered, axis=-1, keepdims=True)
    out = centered * lax.rsqrt(var + layer_norm_eps) * gamma_ref[0] + beta_ref[0]

    out_ref[...] = out.reshape(Bt, S, H).astype(out_ref.dtype)


def _vmem_capacity_bytes():
    try:
        return int(pltpu.get_tpu_info().vmem_capacity_bytes)
    except Exception:
        return 128 * 1024 * 1024   # conservative fallback (v5e/v6e physical VMEM)


def _pick_kv_tile(S, vmem_cap_bytes):
    """Key-tile size for the flash-style path; generation-aware threshold."""
    # Tighter threshold on v7x-class parts (64 MiB VMEM per TC).
    thr = 512 if vmem_cap_bytes >= 96 * 1024 * 1024 else 256
    if S <= thr:
        return S
    for t in (512, 256, 128):
        if t <= thr and S % t == 0:
            return t
    # TODO(synk): ragged S (no 128-multiple divisor) falls back to single-shot softmax.
    return S


def _block_vmem_bytes(bt, S, H, d, kv_tile):
    """Rough per-grid-step live-VMEM estimate for a (bt, S, H) block."""
    f32, bf16 = 4, 2
    m = bt * S
    weights = 4 * H * H * bf16 + 6 * H * f32              # single-buffered params
    io = 2 * (2 * m * H * f32) + 2 * (bt * S * f32)       # double-buffered x/out + mask
    qkv = 3 * m * H * bf16 + m * H * f32                  # bf16 q/k/v + one f32 temp
    attn = 2 * S * kv_tile * f32 + 3 * S * d * f32        # per-head scores/probs + acc
    ctx_y = m * H * bf16 + 2 * m * H * f32                # ctx + y + out temporaries
    return weights + io + qkv + attn + ctx_y


def _pick_batch_tile(B, S, H, d, kv_tile, vmem_budget_bytes, target_m=256):
    """Fold batch rows so projection matmuls present M = bt*S >= target_m,
    keeping >= 2 parallel grid points (v7x megacore) and a VMEM budget."""
    best = 1
    for bt in range(1, B + 1):
        if B % bt:
            continue
        if bt > 1 and B >= 2 and B // bt < 2:
            break                                   # would idle one TensorCore on v7x
        if _block_vmem_bytes(bt, S, H, d, kv_tile) > vmem_budget_bytes:
            break
        best = bt
        if bt * S >= target_m:
            break
    return best


def attention_layer(
    hidden_states,      # (B, S, H) float32
    attention_mask,     # (B, S) float32, 1.0 = attend, 0.0 = mask
    params,             # dict of weights (see init_params)
    *,
    num_heads: int,
    layer_norm_eps: float = 1e-12,
):
    B, S, H = hidden_states.shape
    assert H % num_heads == 0
    head_size = H // num_heads
    assert num_heads * head_size == H
    mask3 = attention_mask.reshape(B, 1, S).astype(jnp.float32)

    # bf16 weights: native MXU operand format + half the weight DMA bytes.
    wq = params["wq"].astype(jnp.bfloat16)
    wk = params["wk"].astype(jnp.bfloat16)
    wv = params["wv"].astype(jnp.bfloat16)
    wo = params["wo"].astype(jnp.bfloat16)

    # Generation-aware VMEM limit: ~25% headroom below the physical capacity.
    vmem_cap = _vmem_capacity_bytes()
    vmem_limit = int(min(max(32 * 1024 * 1024, (vmem_cap * 3) // 4), vmem_cap))

    kv_tile = _pick_kv_tile(S, vmem_cap)
    bt = _pick_batch_tile(B, S, H, head_size, kv_tile, vmem_limit // 2)

    kernel = functools.partial(
        _attention_layer_kernel,
        num_heads=num_heads,
        head_size=head_size,
        layer_norm_eps=layer_norm_eps,
        kv_tile=kv_tile,
    )

    # Grid-invariant parameters: single-buffered (they never change across the
    # batch grid), so only x / mask / out get pipeline double-buffers.
    w_spec = pl.BlockSpec((H, H), lambda b: (0, 0), pipeline_mode=pl.Buffered(1))
    p_spec = pl.BlockSpec((1, H), lambda b: (0, 0), pipeline_mode=pl.Buffered(1))

    return pl.pallas_call(
        kernel,
        out_shape=jax.ShapeDtypeStruct((B, S, H), hidden_states.dtype),
        grid_spec=pltpu.PrefetchScalarGridSpec(
            num_scalar_prefetch=0,
            grid=(B // bt,),
            in_specs=[
                pl.BlockSpec((bt, S, H), lambda b: (b, 0, 0)),   # hidden_states
                pl.BlockSpec((bt, 1, S), lambda b: (b, 0, 0)),   # attention_mask
                w_spec, p_spec,                                  # Wq, bq
                w_spec, p_spec,                                  # Wk, bk
                w_spec, p_spec,                                  # Wv, bv
                w_spec, p_spec,                                  # Wo, bo
                p_spec, p_spec,                                  # gamma, beta
            ],
            out_specs=pl.BlockSpec((bt, S, H), lambda b: (b, 0, 0)),
        ),
        compiler_params=pltpu.CompilerParams(
            dimension_semantics=("parallel",),
            vmem_limit_bytes=vmem_limit,
        ),
    )(
        hidden_states, mask3,
        wq, params["bq"],
        wk, params["bk"],
        wv, params["bv"],
        wo, params["bo"],
        params["gamma"], params["beta"],
    )


def init_params(key, hidden_size):
    """Deterministic synthetic parameters.  Linear weights stored as (in, out)
    (i.e. already transposed relative to torch's (out, in))."""
    ks = jax.random.split(key, 8)
    scale = 0.05
    H = hidden_size
    return {
        "wq": scale * jax.random.normal(ks[0], (H, H), jnp.float32),
        "bq": scale * jax.random.normal(ks[1], (1, H), jnp.float32),
        "wk": scale * jax.random.normal(ks[2], (H, H), jnp.float32),
        "bk": scale * jax.random.normal(ks[3], (1, H), jnp.float32),
        "wv": scale * jax.random.normal(ks[4], (H, H), jnp.float32),
        "bv": scale * jax.random.normal(ks[5], (1, H), jnp.float32),
        "wo": scale * jax.random.normal(ks[6], (H, H), jnp.float32),
        "bo": scale * jax.random.normal(ks[7], (1, H), jnp.float32),
        "gamma": jnp.ones((1, H), jnp.float32),
        "beta": jnp.zeros((1, H), jnp.float32),
    }


def _reference(hidden_states, attention_mask, params, *, num_heads, eps=1e-12):
    """Pure-JAX f32 reference mirroring the PyTorch forward (eval mode)."""
    B, S, H = hidden_states.shape
    d = H // num_heads
    q = hidden_states @ params["wq"] + params["bq"][0]
    k = hidden_states @ params["wk"] + params["bk"][0]
    v = hidden_states @ params["wv"] + params["bv"][0]

    def split(t):  # (B,S,H) -> (B,nh,S,d)
        return t.reshape(B, S, num_heads, d).transpose(0, 2, 1, 3)

    qh, kh, vh = split(q), split(k), split(v)
    scores = jnp.einsum("bhqd,bhkd->bhqk", qh, kh) / math.sqrt(d)
    ext = (1.0 - attention_mask)[:, None, None, :] * -10000.0
    scores = scores + ext
    probs = jax.nn.softmax(scores, axis=-1)
    ctx = jnp.einsum("bhqk,bhkd->bhqd", probs, vh)
    ctx = ctx.transpose(0, 2, 1, 3).reshape(B, S, H)
    y = ctx @ params["wo"] + params["bo"][0] + hidden_states
    mean = y.mean(-1, keepdims=True)
    var = ((y - mean) ** 2).mean(-1, keepdims=True)
    return (y - mean) / jnp.sqrt(var + eps) * params["gamma"][0] + params["beta"][0]


if __name__ == "__main__":
    B, S, H = 2, 8, 32
    num_heads = 4

    key = jax.random.PRNGKey(0)
    k_x, k_p = jax.random.split(key)
    x = jax.random.normal(k_x, (B, S, H), jnp.float32)
    # mask out the last 2 key positions of the second batch element
    mask = jnp.ones((B, S), jnp.float32).at[1, -2:].set(0.0)
    params = init_params(k_p, H)

    out = attention_layer(x, mask, params, num_heads=num_heads)
    out = jax.block_until_ready(out)

    ref = _reference(x, mask, params, num_heads=num_heads)
    assert out.shape == (B, S, H)
    # bf16 MXU operands (f32 accumulation) -> slightly looser tolerance than pure f32.
    assert jnp.allclose(out, ref, atol=2e-2, rtol=2e-2), "mismatch vs reference"

    print("KERNEL_OK")
</pallas_src>

<mosaic_0001>
module attributes {stable_mosaic.version = 11 : i64} {
  func.func @_attention_layer_kernel(%arg0: i32, %arg1: memref<1x8x32xf32, #tpu.memory_space<vmem>>, %arg2: memref<1x1x8xf32, #tpu.memory_space<vmem>>, %arg3: memref<32x32xbf16, #tpu.memory_space<vmem>>, %arg4: memref<1x32xf32, #tpu.memory_space<vmem>>, %arg5: memref<32x32xbf16, #tpu.memory_space<vmem>>, %arg6: memref<1x32xf32, #tpu.memory_space<vmem>>, %arg7: memref<32x32xbf16, #tpu.memory_space<vmem>>, %arg8: memref<1x32xf32, #tpu.memory_space<vmem>>, %arg9: memref<32x32xbf16, #tpu.memory_space<vmem>>, %arg10: memref<1x32xf32, #tpu.memory_space<vmem>>, %arg11: memref<1x32xf32, #tpu.memory_space<vmem>>, %arg12: memref<1x32xf32, #tpu.memory_space<vmem>>, %arg13: memref<1x8x32xf32, #tpu.memory_space<vmem>>) attributes {dimension_semantics = [#tpu.dimension_semantics<parallel>], iteration_bounds = array<i64: 2>, scalar_prefetch = 0 : i64, scratch_operands = 0 : i64, tpu.core_type = #tpu.core_type<tc>, window_params = [{transform_indices = @transform_0, window_bounds = array<i64: 1, 8, 32>}, {transform_indices = @transform_1, window_bounds = array<i64: 1, 1, 8>}, {pipeline_mode = #tpu.pipeline_mode<synchronous>, transform_indices = @transform_2, window_bounds = array<i64: 32, 32>}, {pipeline_mode = #tpu.pipeline_mode<synchronous>, transform_indices = @transform_3, window_bounds = array<i64: 1, 32>}, {pipeline_mode = #tpu.pipeline_mode<synchronous>, transform_indices = @transform_4, window_bounds = array<i64: 32, 32>}, {pipeline_mode = #tpu.pipeline_mode<synchronous>, transform_indices = @transform_5, window_bounds = array<i64: 1, 32>}, {pipeline_mode = #tpu.pipeline_mode<synchronous>, transform_indices = @transform_6, window_bounds = array<i64: 32, 32>}, {pipeline_mode = #tpu.pipeline_mode<synchronous>, transform_indices = @transform_7, window_bounds = array<i64: 1, 32>}, {pipeline_mode = #tpu.pipeline_mode<synchronous>, transform_indices = @transform_8, window_bounds = array<i64: 32, 32>}, {pipeline_mode = #tpu.pipeline_mode<synchronous>, transform_indices = @transform_9, window_bounds = array<i64: 1, 32>}, {pipeline_mode = #tpu.pipeline_mode<synchronous>, transform_indices = @transform_10, window_bounds = array<i64: 1, 32>}, {pipeline_mode = #tpu.pipeline_mode<synchronous>, transform_indices = @transform_11, window_bounds = array<i64: 1, 32>}, {transform_indices = @transform_12, window_bounds = array<i64: 1, 8, 32>}]} {
    %c0 = arith.constant 0 : index
    %c0_0 = arith.constant 0 : index
    %c0_1 = arith.constant 0 : index
    %0 = vector.load %arg1[%c0, %c0_0, %c0_1] : memref<1x8x32xf32, #tpu.memory_space<vmem>>, vector<1x8x32xf32>
    %1 = vector.shape_cast %0 : vector<1x8x32xf32> to vector<8x32xf32>
    %2 = arith.truncf %1 : vector<8x32xf32> to vector<8x32xbf16>
    %c0_2 = arith.constant 0 : index
    %c0_3 = arith.constant 0 : index
    %3 = vector.load %arg3[%c0_2, %c0_3] : memref<32x32xbf16, #tpu.memory_space<vmem>>, vector<32x32xbf16>
    %cst = arith.constant dense<0.000000e+00> : vector<8x32xf32>
    %4 = tpu.matmul %2, %3, %cst {dimension_numbers = #tpu.dot_dimension_numbers<[1], [0], [0], [1], [0, 0, 1, 1], [], []>} : vector<8x32xbf16>, vector<32x32xbf16>, vector<8x32xf32> -> vector<8x32xf32>
    %c0_4 = arith.constant 0 : index
    %c0_5 = arith.constant 0 : index
    %5 = vector.load %arg4[%c0_4, %c0_5] : memref<1x32xf32, #tpu.memory_space<vmem>>, vector<1x32xf32>
    %6 = vector.shape_cast %5 : vector<1x32xf32> to vector<32xf32>
    %7 = vector.shape_cast %6 : vector<32xf32> to vector<1x32xf32>
    %8 = vector.broadcast %7 : vector<1x32xf32> to vector<8x32xf32>
    %9 = arith.addf %4, %8 : vector<8x32xf32>
    %cst_6 = arith.constant 0.353553385 : f32
    %10 = vector.broadcast %cst_6 : f32 to vector<8x32xf32>
    %11 = arith.mulf %9, %10 : vector<8x32xf32>
    %12 = arith.truncf %11 : vector<8x32xf32> to vector<8x32xbf16>
    %c0_7 = arith.constant 0 : index
    %c0_8 = arith.constant 0 : index
    %13 = vector.load %arg5[%c0_7, %c0_8] : memref<32x32xbf16, #tpu.memory_space<vmem>>, vector<32x32xbf16>
    %cst_9 = arith.constant dense<0.000000e+00> : vector<8x32xf32>
    %14 = tpu.matmul %2, %13, %cst_9 {dimension_numbers = #tpu.dot_dimension_numbers<[1], [0], [0], [1], [0, 0, 1, 1], [], []>} : vector<8x32xbf16>, vector<32x32xbf16>, vector<8x32xf32> -> vector<8x32xf32>
    %c0_10 = arith.constant 0 : index
    %c0_11 = arith.constant 0 : index
    %15 = vector.load %arg6[%c0_10, %c0_11] : memref<1x32xf32, #tpu.memory_space<vmem>>, vector<1x32xf32>
    %16 = vector.shape_cast %15 : vector<1x32xf32> to vector<32xf32>
    %17 = vector.shape_cast %16 : vector<32xf32> to vector<1x32xf32>
    %18 = vector.broadcast %17 : vector<1x32xf32> to vector<8x32xf32>
    %19 = arith.addf %14, %18 : vector<8x32xf32>
    %20 = arith.truncf %19 : vector<8x32xf32> to vector<8x32xbf16>
    %c0_12 = arith.constant 0 : index
    %c0_13 = arith.constant 0 : index
    %21 = vector.load %arg7[%c0_12, %c0_13] : memref<32x32xbf16, #tpu.memory_space<vmem>>, vector<32x32xbf16>
    %cst_14 = arith.constant dense<0.000000e+00> : vector<8x32xf32>
    %22 = tpu.matmul %2, %21, %cst_14 {dimension_numbers = #tpu.dot_dimension_numbers<[1], [0], [0], [1], [0, 0, 1, 1], [], []>} : vector<8x32xbf16>, vector<32x32xbf16>, vector<8x32xf32> -> vector<8x32xf32>
    %c0_15 = arith.constant 0 : index
    %c0_16 = arith.constant 0 : index
    %23 = vector.load %arg8[%c0_15, %c0_16] : memref<1x32xf32, #tpu.memory_space<vmem>>, vector<1x32xf32>
    %24 = vector.shape_cast %23 : vector<1x32xf32> to vector<32xf32>
    %25 = vector.shape_cast %24 : vector<32xf32> to vector<1x32xf32>
    %26 = vector.broadcast %25 : vector<1x32xf32> to vector<8x32xf32>
    %27 = arith.addf %22, %26 : vector<8x32xf32>
    %28 = arith.truncf %27 : vector<8x32xf32> to vector<8x32xbf16>
    %c0_17 = arith.constant 0 : index
    %c0_18 = arith.constant 0 : index
    %c0_19 = arith.constant 0 : index
    %29 = vector.load %arg2[%c0_17, %c0_18, %c0_19] : memref<1x1x8xf32, #tpu.memory_space<vmem>>, vector<1x1x8xf32>
    %cst_20 = arith.constant 1.000000e+00 : f32
    %30 = vector.broadcast %cst_20 : f32 to vector<1x1x8xf32>
    %31 = arith.subf %30, %29 : vector<1x1x8xf32>
    %cst_21 = arith.constant -1.000000e+04 : f32
    %32 = vector.broadcast %cst_21 : f32 to vector<1x1x8xf32>
    %33 = arith.mulf %31, %32 : vector<1x1x8xf32>
    %34 = vector.shape_cast %33 : vector<1x1x8xf32> to vector<1x8xf32>
    %35 = vector.extract_strided_slice %12 {offsets = [0, 0], sizes = [8, 8], strides = [1, 1]} : vector<8x32xbf16> to vector<8x8xbf16>
    %36 = vector.extract_strided_slice %20 {offsets = [0, 0], sizes = [8, 8], strides = [1, 1]} : vector<8x32xbf16> to vector<8x8xbf16>
    %37 = vector.extract_strided_slice %28 {offsets = [0, 0], sizes = [8, 8], strides = [1, 1]} : vector<8x32xbf16> to vector<8x8xbf16>
    %cst_22 = arith.constant dense<0.000000e+00> : vector<8x8xf32>
    %38 = tpu.matmul %35, %36, %cst_22 {dimension_numbers = #tpu.dot_dimension_numbers<[1], [1], [0], [0], [0, 0, 1, 0], [], []>} : vector<8x8xbf16>, vector<8x8xbf16>, vector<8x8xf32> -> vector<8x8xf32>
    %39 = vector.broadcast %34 : vector<1x8xf32> to vector<8x8xf32>
    %40 = arith.addf %38, %39 : vector<8x8xf32>
    %cst_23 = arith.constant dense<0xFF800000> : vector<8xf32>
    %41 = vector.multi_reduction <maximumf>, %40, %cst_23 [1] : vector<8x8xf32> to vector<8xf32>
    %42 = vector.shape_cast %41 : vector<8xf32> to vector<8x1xf32>
    %43 = vector.broadcast %42 : vector<8x1xf32> to vector<8x8xf32>
    %44 = arith.subf %40, %43 : vector<8x8xf32>
    %45 = math.exp %44 : vector<8x8xf32>
    %cst_24 = arith.constant dense<0.000000e+00> : vector<8xf32>
    %46 = vector.multi_reduction <add>, %45, %cst_24 [1] : vector<8x8xf32> to vector<8xf32>
    %47 = vector.shape_cast %46 : vector<8xf32> to vector<8x1xf32>
    %48 = tpu.reciprocal %47 {approx = true} : vector<8x1xf32> -> vector<8x1xf32>
    %49 = arith.truncf %45 : vector<8x8xf32> to vector<8x8xbf16>
    %cst_25 = arith.constant dense<0.000000e+00> : vector<8x8xf32>
    %50 = tpu.matmul %49, %37, %cst_25 {dimension_numbers = #tpu.dot_dimension_numbers<[1], [0], [0], [1], [0, 0, 1, 1], [], []>} : vector<8x8xbf16>, vector<8x8xbf16>, vector<8x8xf32> -> vector<8x8xf32>
    %51 = vector.broadcast %48 : vector<8x1xf32> to vector<8x8xf32>
    %52 = arith.mulf %50, %51 : vector<8x8xf32>
    %53 = arith.truncf %52 : vector<8x8xf32> to vector<8x8xbf16>
    %54 = vector.extract_strided_slice %12 {offsets = [0, 8], sizes = [8, 8], strides = [1, 1]} : vector<8x32xbf16> to vector<8x8xbf16>
    %55 = vector.extract_strided_slice %20 {offsets = [0, 8], sizes = [8, 8], strides = [1, 1]} : vector<8x32xbf16> to vector<8x8xbf16>
    %56 = vector.extract_strided_slice %28 {offsets = [0, 8], sizes = [8, 8], strides = [1, 1]} : vector<8x32xbf16> to vector<8x8xbf16>
    %cst_26 = arith.constant dense<0.000000e+00> : vector<8x8xf32>
    %57 = tpu.matmul %54, %55, %cst_26 {dimension_numbers = #tpu.dot_dimension_numbers<[1], [1], [0], [0], [0, 0, 1, 0], [], []>} : vector<8x8xbf16>, vector<8x8xbf16>, vector<8x8xf32> -> vector<8x8xf32>
    %58 = vector.broadcast %34 : vector<1x8xf32> to vector<8x8xf32>
    %59 = arith.addf %57, %58 : vector<8x8xf32>
    %cst_27 = arith.constant dense<0xFF800000> : vector<8xf32>
    %60 = vector.multi_reduction <maximumf>, %59, %cst_27 [1] : vector<8x8xf32> to vector<8xf32>
    %61 = vector.shape_cast %60 : vector<8xf32> to vector<8x1xf32>
    %62 = vector.broadcast %61 : vector<8x1xf32> to vector<8x8xf32>
    %63 = arith.subf %59, %62 : vector<8x8xf32>
    %64 = math.exp %63 : vector<8x8xf32>
    %cst_28 = arith.constant dense<0.000000e+00> : vector<8xf32>
    %65 = vector.multi_reduction <add>, %64, %cst_28 [1] : vector<8x8xf32> to vector<8xf32>
    %66 = vector.shape_cast %65 : vector<8xf32> to vector<8x1xf32>
    %67 = tpu.reciprocal %66 {approx = true} : vector<8x1xf32> -> vector<8x1xf32>
    %68 = arith.truncf %64 : vector<8x8xf32> to vector<8x8xbf16>
    %cst_29 = arith.constant dense<0.000000e+00> : vector<8x8xf32>
    %69 = tpu.matmul %68, %56, %cst_29 {dimension_numbers = #tpu.dot_dimension_numbers<[1], [0], [0], [1], [0, 0, 1, 1], [], []>} : vector<8x8xbf16>, vector<8x8xbf16>, vector<8x8xf32> -> vector<8x8xf32>
    %70 = vector.broadcast %67 : vector<8x1xf32> to vector<8x8xf32>
    %71 = arith.mulf %69, %70 : vector<8x8xf32>
    %72 = arith.truncf %71 : vector<8x8xf32> to vector<8x8xbf16>
    %73 = vector.extract_strided_slice %12 {offsets = [0, 16], sizes = [8, 8], strides = [1, 1]} : vector<8x32xbf16> to vector<8x8xbf16>
    %74 = vector.extract_strided_slice %20 {offsets = [0, 16], sizes = [8, 8], strides = [1, 1]} : vector<8x32xbf16> to vector<8x8xbf16>
    %75 = vector.extract_strided_slice %28 {offsets = [0, 16], sizes = [8, 8], strides = [1, 1]} : vector<8x32xbf16> to vector<8x8xbf16>
    %cst_30 = arith.constant dense<0.000000e+00> : vector<8x8xf32>
    %76 = tpu.matmul %73, %74, %cst_30 {dimension_numbers = #tpu.dot_dimension_numbers<[1], [1], [0], [0], [0, 0, 1, 0], [], []>} : vector<8x8xbf16>, vector<8x8xbf16>, vector<8x8xf32> -> vector<8x8xf32>
    %77 = vector.broadcast %34 : vector<1x8xf32> to vector<8x8xf32>
    %78 = arith.addf %76, %77 : vector<8x8xf32>
    %cst_31 = arith.constant dense<0xFF800000> : vector<8xf32>
    %79 = vector.multi_reduction <maximumf>, %78, %cst_31 [1] : vector<8x8xf32> to vector<8xf32>
    %80 = vector.shape_cast %79 : vector<8xf32> to vector<8x1xf32>
    %81 = vector.broadcast %80 : vector<8x1xf32> to vector<8x8xf32>
    %82 = arith.subf %78, %81 : vector<8x8xf32>
    %83 = math.exp %82 : vector<8x8xf32>
    %cst_32 = arith.constant dense<0.000000e+00> : vector<8xf32>
    %84 = vector.multi_reduction <add>, %83, %cst_32 [1] : vector<8x8xf32> to vector<8xf32>
    %85 = vector.shape_cast %84 : vector<8xf32> to vector<8x1xf32>
    %86 = tpu.reciprocal %85 {approx = true} : vector<8x1xf32> -> vector<8x1xf32>
    %87 = arith.truncf %83 : vector<8x8xf32> to vector<8x8xbf16>
    %cst_33 = arith.constant dense<0.000000e+00> : vector<8x8xf32>
    %88 = tpu.matmul %87, %75, %cst_33 {dimension_numbers = #tpu.dot_dimension_numbers<[1], [0], [0], [1], [0, 0, 1, 1], [], []>} : vector<8x8xbf16>, vector<8x8xbf16>, vector<8x8xf32> -> vector<8x8xf32>
    %89 = vector.broadcast %86 : vector<8x1xf32> to vector<8x8xf32>
    %90 = arith.mulf %88, %89 : vector<8x8xf32>
    %91 = arith.truncf %90 : vector<8x8xf32> to vector<8x8xbf16>
    %92 = vector.extract_strided_slice %12 {offsets = [0, 24], sizes = [8, 8], strides = [1, 1]} : vector<8x32xbf16> to vector<8x8xbf16>
    %93 = vector.extract_strided_slice %20 {offsets = [0, 24], sizes = [8, 8], strides = [1, 1]} : vector<8x32xbf16> to vector<8x8xbf16>
    %94 = vector.extract_strided_slice %28 {offsets = [0, 24], sizes = [8, 8], strides = [1, 1]} : vector<8x32xbf16> to vector<8x8xbf16>
    %cst_34 = arith.constant dense<0.000000e+00> : vector<8x8xf32>
    %95 = tpu.matmul %92, %93, %cst_34 {dimension_numbers = #tpu.dot_dimension_numbers<[1], [1], [0], [0], [0, 0, 1, 0], [], []>} : vector<8x8xbf16>, vector<8x8xbf16>, vector<8x8xf32> -> vector<8x8xf32>
    %96 = vector.broadcast %34 : vector<1x8xf32> to vector<8x8xf32>
    %97 = arith.addf %95, %96 : vector<8x8xf32>
    %cst_35 = arith.constant dense<0xFF800000> : vector<8xf32>
    %98 = vector.multi_reduction <maximumf>, %97, %cst_35 [1] : vector<8x8xf32> to vector<8xf32>
    %99 = vector.shape_cast %98 : vector<8xf32> to vector<8x1xf32>
    %100 = vector.broadcast %99 : vector<8x1xf32> to vector<8x8xf32>
    %101 = arith.subf %97, %100 : vector<8x8xf32>
    %102 = math.exp %101 : vector<8x8xf32>
    %cst_36 = arith.constant dense<0.000000e+00> : vector<8xf32>
    %103 = vector.multi_reduction <add>, %102, %cst_36 [1] : vector<8x8xf32> to vector<8xf32>
    %104 = vector.shape_cast %103 : vector<8xf32> to vector<8x1xf32>
    %105 = tpu.reciprocal %104 {approx = true} : vector<8x1xf32> -> vector<8x1xf32>
    %106 = arith.truncf %102 : vector<8x8xf32> to vector<8x8xbf16>
    %cst_37 = arith.constant dense<0.000000e+00> : vector<8x8xf32>
    %107 = tpu.matmul %106, %94, %cst_37 {dimension_numbers = #tpu.dot_dimension_numbers<[1], [0], [0], [1], [0, 0, 1, 1], [], []>} : vector<8x8xbf16>, vector<8x8xbf16>, vector<8x8xf32> -> vector<8x8xf32>
    %108 = vector.broadcast %105 : vector<8x1xf32> to vector<8x8xf32>
    %109 = arith.mulf %107, %108 : vector<8x8xf32>
    %110 = arith.truncf %109 : vector<8x8xf32> to vector<8x8xbf16>
    %111 = tpu.concatenate %53, %72, %91, %110 in 1 : vector<8x8xbf16>, vector<8x8xbf16>, vector<8x8xbf16>, vector<8x8xbf16> -> vector<8x32xbf16>
    %c0_38 = arith.constant 0 : index
    %c0_39 = arith.constant 0 : index
    %112 = vector.load %arg9[%c0_38, %c0_39] : memref<32x32xbf16, #tpu.memory_space<vmem>>, vector<32x32xbf16>
    %cst_40 = arith.constant dense<0.000000e+00> : vector<8x32xf32>
    %113 = tpu.matmul %111, %112, %cst_40 {dimension_numbers = #tpu.dot_dimension_numbers<[1], [0], [0], [1], [0, 0, 1, 1], [], []>} : vector<8x32xbf16>, vector<32x32xbf16>, vector<8x32xf32> -> vector<8x32xf32>
    %c0_41 = arith.constant 0 : index
    %c0_42 = arith.constant 0 : index
    %114 = vector.load %arg10[%c0_41, %c0_42] : memref<1x32xf32, #tpu.memory_space<vmem>>, vector<1x32xf32>
    %115 = vector.shape_cast %114 : vector<1x32xf32> to vector<32xf32>
    %116 = vector.shape_cast %115 : vector<32xf32> to vector<1x32xf32>
    %117 = vector.broadcast %116 : vector<1x32xf32> to vector<8x32xf32>
    %118 = arith.addf %113, %117 : vector<8x32xf32>
    %119 = arith.addf %118, %1 : vector<8x32xf32>
    %cst_43 = arith.constant dense<0.000000e+00> : vector<8xf32>
    %120 = vector.multi_reduction <add>, %119, %cst_43 [1] : vector<8x32xf32> to vector<8xf32>
    %121 = vector.shape_cast %120 : vector<8xf32> to vector<8x1xf32>
    %cst_44 = arith.constant 3.200000e+01 : f32
    %122 = vector.broadcast %cst_44 : f32 to vector<8x1xf32>
    %123 = arith.divf %121, %122 : vector<8x1xf32>
    %124 = vector.broadcast %123 : vector<8x1xf32> to vector<8x32xf32>
    %125 = arith.subf %119, %124 : vector<8x32xf32>
    %126 = arith.mulf %125, %125 : vector<8x32xf32>
    %cst_45 = arith.constant dense<0.000000e+00> : vector<8xf32>
    %127 = vector.multi_reduction <add>, %126, %cst_45 [1] : vector<8x32xf32> to vector<8xf32>
    %128 = vector.shape_cast %127 : vector<8xf32> to vector<8x1xf32>
    %cst_46 = arith.constant 3.200000e+01 : f32
    %129 = vector.broadcast %cst_46 : f32 to vector<8x1xf32>
    %130 = arith.divf %128, %129 : vector<8x1xf32>
    %cst_47 = arith.constant 9.99999996E-13 : f32
    %131 = vector.broadcast %cst_47 : f32 to vector<8x1xf32>
    %132 = arith.addf %130, %131 : vector<8x1xf32>
    %133 = math.rsqrt %132 : vector<8x1xf32>
    %134 = vector.broadcast %133 : vector<8x1xf32> to vector<8x32xf32>
    %135 = arith.mulf %125, %134 : vector<8x32xf32>
    %c0_48 = arith.constant 0 : index
    %c0_49 = arith.constant 0 : index
    %136 = vector.load %arg11[%c0_48, %c0_49] : memref<1x32xf32, #tpu.memory_space<vmem>>, vector<1x32xf32>
    %137 = vector.shape_cast %136 : vector<1x32xf32> to vector<32xf32>
    %138 = vector.shape_cast %137 : vector<32xf32> to vector<1x32xf32>
    %139 = vector.broadcast %138 : vector<1x32xf32> to vector<8x32xf32>
    %140 = arith.mulf %135, %139 : vector<8x32xf32>
    %c0_50 = arith.constant 0 : index
    %c0_51 = arith.constant 0 : index
    %141 = vector.load %arg12[%c0_50, %c0_51] : memref<1x32xf32, #tpu.memory_space<vmem>>, vector<1x32xf32>
    %142 = vector.shape_cast %141 : vector<1x32xf32> to vector<32xf32>
    %143 = vector.shape_cast %142 : vector<32xf32> to vector<1x32xf32>
    %144 = vector.broadcast %143 : vector<1x32xf32> to vector<8x32xf32>
    %145 = arith.addf %140, %144 : vector<8x32xf32>
    %146 = vector.shape_cast %145 : vector<8x32xf32> to vector<1x8x32xf32>
    %c0_52 = arith.constant 0 : index
    %c0_53 = arith.constant 0 : index
    %c0_54 = arith.constant 0 : index
    %147 = vector.load %arg13[%c0_52, %c0_53, %c0_54] : memref<1x8x32xf32, #tpu.memory_space<vmem>>, vector<1x8x32xf32>
    tpu.vector_store %arg13[%c0_52, %c0_53, %c0_54], %146 {strides = array<i32>} : memref<1x8x32xf32, #tpu.memory_space<vmem>>, vector<1x8x32xf32>,
    return
  }
  func.func @transform_0(%arg0: i32) -> (i32, i32, i32) {
    %c0_i32 = arith.constant 0 : i32
    %c0_i32_0 = arith.constant 0 : i32
    %c0_i32_1 = arith.constant 0 : i32
    return %arg0, %c0_i32, %c0_i32_0 : i32, i32, i32
  }
  func.func @transform_1(%arg0: i32) -> (i32, i32, i32) {
    %c0_i32 = arith.constant 0 : i32
    %c0_i32_0 = arith.constant 0 : i32
    %c0_i32_1 = arith.constant 0 : i32
    return %arg0, %c0_i32, %c0_i32_0 : i32, i32, i32
  }
  func.func @transform_2(%arg0: i32) -> (i32, i32) {
    %c0_i32 = arith.constant 0 : i32
    %c0_i32_0 = arith.constant 0 : i32
    %c0_i32_1 = arith.constant 0 : i32
    return %c0_i32, %c0_i32_0 : i32, i32
  }
  func.func @transform_3(%arg0: i32) -> (i32, i32) {
    %c0_i32 = arith.constant 0 : i32
    %c0_i32_0 = arith.constant 0 : i32
    %c0_i32_1 = arith.constant 0 : i32
    return %c0_i32, %c0_i32_0 : i32, i32
  }
  func.func @transform_4(%arg0: i32) -> (i32, i32) {
    %c0_i32 = arith.constant 0 : i32
    %c0_i32_0 = arith.constant 0 : i32
    %c0_i32_1 = arith.constant 0 : i32
    return %c0_i32, %c0_i32_0 : i32, i32
  }
  func.func @transform_5(%arg0: i32) -> (i32, i32) {
    %c0_i32 = arith.constant 0 : i32
    %c0_i32_0 = arith.constant 0 : i32
    %c0_i32_1 = arith.constant 0 : i32
    return %c0_i32, %c0_i32_0 : i32, i32
  }
  func.func @transform_6(%arg0: i32) -> (i32, i32) {
    %c0_i32 = arith.constant 0 : i32
    %c0_i32_0 = arith.constant 0 : i32
    %c0_i32_1 = arith.constant 0 : i32
    return %c0_i32, %c0_i32_0 : i32, i32
  }
  func.func @transform_7(%arg0: i32) -> (i32, i32) {
    %c0_i32 = arith.constant 0 : i32
    %c0_i32_0 = arith.constant 0 : i32
    %c0_i32_1 = arith.constant 0 : i32
    return %c0_i32, %c0_i32_0 : i32, i32
  }
  func.func @transform_8(%arg0: i32) -> (i32, i32) {
    %c0_i32 = arith.constant 0 : i32
    %c0_i32_0 = arith.constant 0 : i32
    %c0_i32_1 = arith.constant 0 : i32
    return %c0_i32, %c0_i32_0 : i32, i32
  }
  func.func @transform_9(%arg0: i32) -> (i32, i32) {
    %c0_i32 = arith.constant 0 : i32
    %c0_i32_0 = arith.constant 0 : i32
    %c0_i32_1 = arith.constant 0 : i32
    return %c0_i32, %c0_i32_0 : i32, i32
  }
  func.func @transform_10(%arg0: i32) -> (i32, i32) {
    %c0_i32 = arith.constant 0 : i32
    %c0_i32_0 = arith.constant 0 : i32
    %c0_i32_1 = arith.constant 0 : i32
    return %c0_i32, %c0_i32_0 : i32, i32
  }
  func.func @transform_11(%arg0: i32) -> (i32, i32) {
    %c0_i32 = arith.constant 0 : i32
    %c0_i32_0 = arith.constant 0 : i32
    %c0_i32_1 = arith.constant 0 : i32
    return %c0_i32, %c0_i32_0 : i32, i32
  }
  func.func @transform_12(%arg0: i32) -> (i32, i32, i32) {
    %c0_i32 = arith.constant 0 : i32
    %c0_i32_0 = arith.constant 0 : i32
    %c0_i32_1 = arith.constant 0 : i32
    return %arg0, %c0_i32, %c0_i32_0 : i32, i32, i32
  }
}

</mosaic_0001>

<bundles_post_ra>
// kernel: tpu_custom_call.1
= control target key start
LH: loop header
LB: loop body
LE: loop exit
PB: predicated region body
PF: predicated region fallthrough
CT: control target
= control target key end

     0   :  { %s2993_s0 = inlined_call_operand.hbm [shape: f32[2,8,32], index: 0, kind: input, shape index: {}]   ;;  %s2994_s1 = inlined_call_operand.hbm [shape: f32[2,1,8], index: 1, kind: input, shape index: {}]   ;;  %s2995_s2 = inlined_call_operand.hbm [shape: bf16[32,32], index: 2, kind: input, shape index: {}]   ;;  %s2996_s3 = inlined_call_operand.hbm [shape: f32[1,32], index: 3, kind: input, shape index: {}]   ;;  %s2997_s4 = inlined_call_operand.hbm [shape: bf16[32,32], index: 4, kind: input, shape index: {}]   ;;  %s2998_s5 = inlined_call_operand.hbm [shape: f32[1,32], index: 5, kind: input, shape index: {}]   ;;  %s2999_s6 = inlined_call_operand.hbm [shape: bf16[32,32], index: 6, kind: input, shape index: {}]   ;;  %s3000_s7 = inlined_call_operand.hbm [shape: f32[1,32], index: 7, kind: input, shape index: {}]   ;;  %s3001_s8 = inlined_call_operand.hbm [shape: bf16[32,32], index: 8, kind: input, shape index: {}]   ;;  %s3002_s9 = inlined_call_operand.hbm [shape: f32[1,32], index: 9, kind: input, shape index: {}]   ;;  %s3003_s10 = inlined_call_operand.hbm [shape: f32[1,32], index: 10, kind: input, shape index: {}]   ;;  %s3004_s11 = inlined_call_operand.hbm [shape: f32[1,32], index: 11, kind: input, shape index: {}]   ;;  %s3005_s12 = inlined_call_operand.hbm [shape: f32[2,8,32], index: 12, kind: output, shape index: {}]  }
   0x1   :  { %3016 = sst [smem:[#allocation33_spill]] %s2993_s0 }
   0x2   :  { %3017 = sst [smem:[#allocation34_spill]] %s2994_s1 }
   0x3   :  { %3018 = sst [smem:[#allocation35_spill]] %s2995_s2 }
   0x4   :  { %3019 = sst [smem:[#allocation36_spill]] %s2996_s3 }
   0x5   :  { %3020 = sst [smem:[#allocation37_spill]] %s2997_s4 }
   0x6   :  { %3021 = sst [smem:[#allocation38_spill]] %s2998_s5 }
   0x7   :  { %3022 = sst [smem:[#allocation39_spill]] %s2999_s6 }
   0x8   :  { %3023 = sst [smem:[#allocation40_spill]] %s3005_s12 }
   0x9   :  { %17 = vsyncpa [#allocation3], 0 }
   0xa   :  { %19 = vsyncpa [#allocation3 + $0x1], 0 }
   0xb   :  { %20 = vsyncpa [#allocation6], 0 }
   0xc   :  { %22 = vsyncpa [#allocation6 + $0x1], 0 }
   0xd   :  { %23 = vsyncpa [#allocation9], 0 }
   0xe   :  { %24 = vsyncpa [#allocation12], 0 }
   0xf   :  { %25 = vsyncpa [#allocation15], 0 }
  0x10   :  { %26 = vsyncpa [#allocation18], 0 }
  0x11   :  { %27 = vsyncpa [#allocation21], 0 }
  0x12   :  { %28 = vsyncpa [#allocation4], 0 }
  0x13   :  { %30 = vsyncpa [#allocation4 + $0x1], 0  ;;  %s2441_s21 = smov 0   ;;  %s2443_s22 = smov 0  }
  0x14   :  { %s2445_s23 = smov 0   ;;  %s2447_s24 = smov 0  }
  0x15 LB: > { %s2353_s25 = smov [#allocation7]   ;;  %s2462_s27 = sadd.s32 4294967295, %s2351_s24   ;;  %s2351_s24 = sphi %s2447_s24, %s3065_s24   ;;  %s2347_s23 = sphi %s2445_s23, %s3064_s23   ;;  %s2343_s22 = sphi %s2443_s22, %s3063_s22   ;;  %s2339_s21 = sphi %s2441_s21, %s3062_s21  }
  0x16   : > { %s341_s26 = sshll.u32 %s2353_s25, 4  ;;  %p1563_p0 = scmp.ge.s32.totalorder %s2351_s24, 1  ;;  %s2467_s26 = int_to_ptr.vmem [resolvable:$true] %s341_s26 }
  0x17   : > { %p3012_p1 = scmp.eq.s32.totalorder %s2462_s27, 0  ;;  %p329_p2 = scmp.lt.s32.totalorder %s2351_s24, 3 }
  0x18   : > { %s2354_s29 = smov [#allocation8]   ;;  %s2355_s14 = smov [#allocation11]  }
  0x19   : > { %p2469_p3 = pnand %p1563_p0, %p329_p2  ;;  %s355_s30 = sshll.u32 %s2354_s29, 4  ;;  %s2482_s30 = int_to_ptr.vmem [resolvable:$true] %s355_s30 }
  0x1a   : > { %s379_s15 = sshll.u32 %s2355_s14, 4  ;;  %s3027_s2 = sld [smem:[#allocation35_spill]]  ;;  %s2484_s15 = int_to_ptr.vmem [resolvable:$true] %s379_s15 }
  0x1b   : > { %s3024_s28 = scalar_select %p2469_p3, 1, 0 }
  0x1c   : > { %p1775_p5 = pneg %p2469_p3 }
  0x1d   : > { %3025 = sst [smem:[#allocation32_spill]] %s3024_s28 }
  0x1e   : > { %p2478_p6 = pnand %p1775_p5, %p3012_p1 }
  0x20   : > { %s1917_s18 = scalar_lea.hbm %s3027_s2, 256  ;;  %p2494_p8 = pneg %p2478_p6 }
  0x21   : > { %p1918_p7 = scmp.ne.s32.totalorder %s3027_s2, %s1917_s18  ;;  %p1924_p11 = scmp.lt.u32.totalorder %s1917_s18, %s3027_s2 }
  0x23   : > { %p1920_p9 = pnand %p2494_p8, %p1918_p7 }
  0x25   : > { %p1921_p10 = pneg %p1920_p9 }
  0x27   : > { %p1926_p12 = pnand %p1924_p11, %p1921_p10 }
  0x29   : > { %1929 = shalt.err (!%p1926_p12)
}
  0x2a   : > { %s1930_s16 = scalar_lea.vmem %s2467_s26, 256  ;;  %p1938_p5 = scmp.lt.s32.totalorder %s2467_s26, %s2467_s26 }
  0x2b   : > { %p1931_p13 = scmp.ne.s32.totalorder %s2467_s26, %s1930_s16  ;;  %p1939_p4 = scmp.lt.s32.totalorder %s1930_s16, %s1930_s16 }
  0x2d   : > { %p1933_p0 = pnand %p1931_p13, %p2494_p8  ;;  %p1940_p7 = por %p1939_p4, %p1938_p5 }
  0x2f   : > { %p1934_p2 = pneg %p1933_p0 }
  0x31   : > { %p1941_p9 = pnand %p1940_p7, %p1934_p2 }
  0x33   : > { %1944 = shalt.err (!%p1941_p9)
}
  0x34   : > { %s3010_s17 = smov 64   ;;  %s2357_s18 = smov 4  }
  0x35   : > { %1778 = dma.hbm_to_vmem [thread:$0]  (!%p2478_p6), %s3027_s2, 256, %s2467_s26, [#allocation6], %s3010_s17, %s3010_s17, %s2357_s18  }
  0x36   : > { %s3029_s3 = sld [smem:[#allocation36_spill]] }
  0x3c   : > { %s1945_s16 = scalar_lea.hbm %s3029_s3, 16 }
  0x3d   : > { %p1946_p4 = scmp.ne.s32.totalorder %s3029_s3, %s1945_s16  ;;  %p1952_p12 = scmp.lt.u32.totalorder %s1945_s16, %s3029_s3 }
  0x3f   : > { %p1948_p10 = pnand %p1946_p4, %p2494_p8 }
  0x41   : > { %p1949_p11 = pneg %p1948_p10 }
  0x43   : > { %p1954_p13 = pnand %p1952_p12, %p1949_p11 }
  0x45   : > { %1957 = shalt.err (!%p1954_p13)
}
  0x46   : > { %s1958_s26 = scalar_lea.vmem %s2482_s30, 16  ;;  %s1965_s12 = scalar_lea.vmem %s2482_s30, 32 }
  0x47   : > { %p1959_p0 = scmp.ne.s32.totalorder %s2482_s30, %s1958_s26  ;;  %p1966_p7 = scmp.lt.s32.totalorder %s2482_s30, %s2482_s30 }
  0x48   : > { %p1967_p9 = scmp.lt.s32.totalorder %s1965_s12, %s1958_s26 }
  0x49   : > { %p1961_p2 = pnand %p1959_p0, %p2494_p8 }
  0x4a   : > { %p1968_p4 = por %p1967_p9, %p1966_p7 }
  0x4b   : > { %p1962_p5 = pneg %p1961_p2 }
  0x4d   : > { %p1969_p10 = pnand %p1968_p4, %p1962_p5 }
  0x4f   : > { %1972 = shalt.err (!%p1969_p10)
}
  0x50   : > { %1781 = dma.hbm_to_vmem [thread:$0]  (!%p2478_p6), %s3029_s3, 16, %s2482_s30, [#allocation9]  }
  0x51   : > { %s3030_s5 = sld [smem:[#allocation38_spill]] }
  0x57   : > { %s1973_s20 = scalar_lea.hbm %s3030_s5, 16 }
  0x58   : > { %p1974_p11 = scmp.ne.s32.totalorder %s3030_s5, %s1973_s20  ;;  %p1980_p0 = scmp.lt.u32.totalorder %s1973_s20, %s3030_s5 }
  0x5a   : > { %p1976_p12 = pnand %p1974_p11, %p2494_p8 }
  0x5c   : > { %p1977_p13 = pneg %p1976_p12 }
  0x5e   : > { %p1982_p2 = pnand %p1980_p0, %p1977_p13 }
  0x60   : > { %1985 = shalt.err (!%p1982_p2)
}
  0x61   : > { %s1986_s30 = scalar_lea.vmem %s2484_s15, 16  ;;  %s1993_s12 = scalar_lea.vmem %s2484_s15, 32 }
  0x62   : > { %p1987_p5 = scmp.ne.s32.totalorder %s2484_s15, %s1986_s30  ;;  %p1994_p4 = scmp.lt.s32.totalorder %s2484_s15, %s2484_s15 }
  0x63   : > { %p1995_p10 = scmp.lt.s32.totalorder %s1993_s12, %s1986_s30 }
  0x64   : > { %p1989_p7 = pnand %p1987_p5, %p2494_p8 }
  0x65   : > { %p1996_p11 = por %p1995_p10, %p1994_p4 }
  0x66   : > { %p1990_p9 = pneg %p1989_p7 }
  0x68   : > { %p1997_p12 = pnand %p1996_p11, %p1990_p9 }
  0x6a   : > { %2000 = shalt.err (!%p1997_p12)
}
  0x6b   : > { %1787 = dma.hbm_to_vmem [thread:$0]  (!%p2478_p6), %s3030_s5, 16, %s2484_s15, [#allocation12]  }
  0x6c   : > { %s2358_s28 = smov [#allocation14]   ;;  %s2359_s20 = smov [#allocation17]  }
  0x6d   : > { %s403_s19 = sshll.u32 %s2358_s28, 4  ;;  %s427_s29 = sshll.u32 %s2359_s20, 4  ;;  %s404_s19 = int_to_ptr.vmem [resolvable:$true] %s403_s19  ;;  %s428_s29 = int_to_ptr.vmem [resolvable:$true] %s427_s29 }
  0x6e   : > { %s2001_s26 = scalar_lea.hbm %s3000_s7, 16 }
  0x6f   : > { %p2002_p13 = scmp.ne.s32.totalorder %s3000_s7, %s2001_s26  ;;  %p2008_p5 = scmp.lt.u32.totalorder %s2001_s26, %s3000_s7 }
  0x71   : > { %p2004_p0 = pnand %p2002_p13, %p2494_p8 }
  0x73   : > { %p2005_p2 = pneg %p2004_p0 }
  0x75   : > { %p2010_p7 = pnand %p2008_p5, %p2005_p2 }
  0x77   : > { %2013 = shalt.err (!%p2010_p7)
}
  0x78   : > { %s2014_s15 = scalar_lea.vmem %s404_s19, 16  ;;  %s2021_s1 = scalar_lea.vmem %s404_s19, 32 }
  0x79   : > { %p2015_p9 = scmp.ne.s32.totalorder %s404_s19, %s2014_s15  ;;  %p2022_p11 = scmp.lt.s32.totalorder %s404_s19, %s404_s19 }
  0x7a   : > { %p2023_p12 = scmp.lt.s32.totalorder %s2021_s1, %s2014_s15 }
  0x7b   : > { %p2017_p4 = pnand %p2015_p9, %p2494_p8 }
  0x7c   : > { %p2024_p1 = por %p2023_p12, %p2022_p11 }
  0x7d   : > { %p2018_p10 = pneg %p2017_p4 }
  0x7f   : > { %p2025_p3 = pnand %p2024_p1, %p2018_p10 }
  0x81   : > { %2028 = shalt.err (!%p2025_p3)
}
  0x82   : > { %1793 = dma.hbm_to_vmem [thread:$0]  (!%p2478_p6), %s3000_s7, 16, %s404_s19, [#allocation15]  }
  0x83   : > { %s2029_s16 = scalar_lea.hbm %s3002_s9, 16 }
  0x84   : > { %p2030_p13 = scmp.ne.s32.totalorder %s3002_s9, %s2029_s16  ;;  %p2036_p3 = scmp.lt.u32.totalorder %s2029_s16, %s3002_s9 }
  0x86   : > { %p2032_p0 = pnand %p2030_p13, %p2494_p8 }
  0x88   : > { %p2033_p1 = pneg %p2032_p0 }
  0x8a   : > { %p2038_p2 = pnand %p2036_p3, %p2033_p1 }
  0x8c   : > { %2041 = shalt.err (!%p2038_p2)
}
  0x8d   : > { %s2042_s15 = scalar_lea.vmem %s428_s29, 16  ;;  %s2049_s19 = scalar_lea.vmem %s428_s29, 32 }
  0x8e   : > { %p2043_p5 = scmp.ne.s32.totalorder %s428_s29, %s2042_s15  ;;  %p2050_p4 = scmp.lt.s32.totalorder %s428_s29, %s428_s29 }
  0x8f   : > { %p2051_p10 = scmp.lt.s32.totalorder %s2049_s19, %s2042_s15 }
  0x90   : > { %p2045_p7 = pnand %p2043_p5, %p2494_p8 }
  0x91   : > { %p2052_p11 = por %p2051_p10, %p2050_p4 }
  0x92   : > { %p2046_p9 = pneg %p2045_p7 }
  0x94   : > { %p2053_p12 = pnand %p2052_p11, %p2046_p9 }
  0x96   : > { %2056 = shalt.err (!%p2053_p12)
}
  0x97   : > { %1799 = dma.hbm_to_vmem [thread:$0]  (!%p2478_p6), %s3002_s9, 16, %s428_s29, [#allocation18]  }
  0x98   : > { %s2360_s20 = smov [#allocation10]   ;;  %s2361_s14 = smov [#allocation13]  }
  0x99   : > { %s365_s17 = sshll.u32 %s2360_s20, 4  ;;  %s389_s16 = sshll.u32 %s2361_s14, 4  ;;  %s366_s17 = int_to_ptr.vmem [resolvable:$true] %s365_s17  ;;  %s390_s16 = int_to_ptr.vmem [resolvable:$true] %s389_s16 }
  0x9a   : > { %s3031_s4 = sld [smem:[#allocation37_spill]] }
  0xa0   : > { %s2057_s12 = scalar_lea.hbm %s3031_s4, 256 }
  0xa1   : > { %p2058_p13 = scmp.ne.s32.totalorder %s3031_s4, %s2057_s12  ;;  %p2064_p3 = scmp.lt.u32.totalorder %s2057_s12, %s3031_s4 }
  0xa3   : > { %p2060_p0 = pnand %p2058_p13, %p2494_p8 }
  0xa5   : > { %p2061_p1 = pneg %p2060_p0 }
  0xa7   : > { %p2066_p2 = pnand %p2064_p3, %p2061_p1 }
  0xa9   : > { %2069 = shalt.err (!%p2066_p2)
}
  0xaa   : > { %s2070_s29 = scalar_lea.vmem %s366_s17, 256  ;;  %p2078_p4 = scmp.lt.s32.totalorder %s366_s17, %s366_s17 }
  0xab   : > { %p2071_p5 = scmp.ne.s32.totalorder %s366_s17, %s2070_s29  ;;  %p2079_p10 = scmp.lt.s32.totalorder %s2070_s29, %s2070_s29 }
  0xad   : > { %p2073_p7 = pnand %p2071_p5, %p2494_p8  ;;  %p2080_p11 = por %p2079_p10, %p2078_p4 }
  0xaf   : > { %p2074_p9 = pneg %p2073_p7 }
  0xb1   : > { %p2081_p12 = pnand %p2080_p11, %p2074_p9 }
  0xb3   : > { %2084 = shalt.err (!%p2081_p12)
}
  0xb4   : > { %s3032_s28 = smov 64   ;;  %s3033_s6 = sld [smem:[#allocation39_spill]] }
  0xb5   : > { %1784 = dma.hbm_to_vmem [thread:$0]  (!%p2478_p6), %s3031_s4, 256, %s366_s17, [#allocation9], %s3032_s28, %s3032_s28, %s2357_s18  }
  0xba   : > { %s2085_s12 = scalar_lea.hbm %s3033_s6, 256 }
  0xbb   : > { %p2086_p13 = scmp.ne.s32.totalorder %s3033_s6, %s2085_s12  ;;  %p2092_p3 = scmp.lt.u32.totalorder %s2085_s12, %s3033_s6 }
  0xbd   : > { %p2088_p0 = pnand %p2086_p13, %p2494_p8 }
  0xbf   : > { %p2089_p1 = pneg %p2088_p0 }
  0xc1   : > { %p2094_p2 = pnand %p2092_p3, %p2089_p1 }
  0xc3   : > { %2097 = shalt.err (!%p2094_p2)
}
  0xc4   : > { %s2098_s29 = scalar_lea.vmem %s390_s16, 256  ;;  %p2106_p4 = scmp.lt.s32.totalorder %s390_s16, %s390_s16 }
  0xc5   : > { %p2099_p5 = scmp.ne.s32.totalorder %s390_s16, %s2098_s29  ;;  %p2107_p10 = scmp.lt.s32.totalorder %s2098_s29, %s2098_s29 }
  0xc7   : > { %p2101_p7 = pnand %p2099_p5, %p2494_p8  ;;  %p2108_p11 = por %p2107_p10, %p2106_p4 }
  0xc9   : > { %p2102_p9 = pneg %p2101_p7 }
  0xcb   : > { %p2109_p12 = pnand %p2108_p11, %p2102_p9 }
  0xcd   : > { %2112 = shalt.err (!%p2109_p12)
}
  0xce   : > { %1790 = dma.hbm_to_vmem [thread:$0]  (!%p2478_p6), %s3033_s6, 256, %s390_s16, [#allocation12], %s3032_s28, %s3032_s28, %s2357_s18  }
  0xcf   : > { %s2362_s14 = smov [#allocation16]   ;;  %s2363_s30 = smov [#allocation19]  }
  0xd0   : > { %s413_s26 = sshll.u32 %s2362_s14, 4  ;;  %s438_s12 = sshll.u32 %s2363_s30, 4  ;;  %s414_s26 = int_to_ptr.vmem [resolvable:$true] %s413_s26  ;;  %s439_s12 = int_to_ptr.vmem [resolvable:$true] %s438_s12 }
  0xd1   : > { %s2113_s19 = scalar_lea.hbm %s3001_s8, 256 }
  0xd2   : > { %p2114_p13 = scmp.ne.s32.totalorder %s3001_s8, %s2113_s19  ;;  %p2120_p3 = scmp.lt.u32.totalorder %s2113_s19, %s3001_s8 }
  0xd4   : > { %p2116_p0 = pnand %p2114_p13, %p2494_p8 }
  0xd6   : > { %p2117_p1 = pneg %p2116_p0 }
  0xd8   : > { %p2122_p2 = pnand %p2120_p3, %p2117_p1 }
  0xda   : > { %2125 = shalt.err (!%p2122_p2)
}
  0xdb   : > { %s2126_s16 = scalar_lea.vmem %s414_s26, 256  ;;  %p2134_p4 = scmp.lt.s32.totalorder %s414_s26, %s414_s26 }
  0xdc   : > { %p2127_p5 = scmp.ne.s32.totalorder %s414_s26, %s2126_s16  ;;  %p2135_p10 = scmp.lt.s32.totalorder %s2126_s16, %s2126_s16 }
  0xde   : > { %p2129_p7 = pnand %p2127_p5, %p2494_p8  ;;  %p2136_p11 = por %p2135_p10, %p2134_p4 }
  0xe0   : > { %p2130_p9 = pneg %p2129_p7 }
  0xe2   : > { %p2137_p12 = pnand %p2136_p11, %p2130_p9 }
  0xe4   : > { %2140 = shalt.err (!%p2137_p12)
}
  0xe5   : > { %1796 = dma.hbm_to_vmem [thread:$0]  (!%p2478_p6), %s3001_s8, 256, %s414_s26, [#allocation15], %s3032_s28, %s3032_s28, %s2357_s18  }
  0xe6   : > { %s2141_s0 = scalar_lea.hbm %s3003_s10, 16 }
  0xe7   : > { %p2142_p13 = scmp.ne.s32.totalorder %s3003_s10, %s2141_s0  ;;  %p2148_p3 = scmp.lt.u32.totalorder %s2141_s0, %s3003_s10 }
  0xe9   : > { %p2144_p0 = pnand %p2142_p13, %p2494_p8 }
  0xeb   : > { %p2145_p1 = pneg %p2144_p0 }
  0xed   : > { %p2150_p2 = pnand %p2148_p3, %p2145_p1 }
  0xef   : > { %2153 = shalt.err (!%p2150_p2)
}
  0xf0   : > { %s2154_s17 = scalar_lea.vmem %s439_s12, 16  ;;  %s2161_s18 = scalar_lea.vmem %s439_s12, 32 }
  0xf1   : > { %p2155_p5 = scmp.ne.s32.totalorder %s439_s12, %s2154_s17  ;;  %p2162_p4 = scmp.lt.s32.totalorder %s439_s12, %s439_s12 }
  0xf2   : > { %p2163_p10 = scmp.lt.s32.totalorder %s2161_s18, %s2154_s17 }
  0xf3   : > { %p2157_p7 = pnand %p2155_p5, %p2494_p8 }
  0xf4   : > { %p2164_p11 = por %p2163_p10, %p2162_p4 }
  0xf5   : > { %p2158_p9 = pneg %p2157_p7 }
  0xf7   : > { %p2165_p12 = pnand %p2164_p11, %p2158_p9 }
  0xf9   : > { %2168 = shalt.err (!%p2165_p12)
}
  0xfa   : > { %1802 = dma.hbm_to_vmem [thread:$0]  (!%p2478_p6), %s3003_s10, 16, %s439_s12, [#allocation18]  }
  0xfb   : > { %s2364_s16 = smov [#allocation20]   ;;  %s2169_s30 = scalar_lea.hbm %s3004_s11, 16 }
  0xfc   : > { %s449_s2 = sshll.u32 %s2364_s16, 4  ;;  %p2170_p13 = scmp.ne.s32.totalorder %s3004_s11, %s2169_s30  ;;  %s450_s2 = int_to_ptr.vmem [resolvable:$true] %s449_s2 }
  0xfd   : > { %p2176_p3 = scmp.lt.u32.totalorder %s2169_s30, %s3004_s11 }
  0xfe   : > { %p2172_p0 = pnand %p2170_p13, %p2494_p8 }
 0x100   : > { %p2173_p1 = pneg %p2172_p0 }
 0x102   : > { %p2178_p2 = pnand %p2176_p3, %p2173_p1 }
 0x104   : > { %2181 = shalt.err (!%p2178_p2)
}
 0x105   : > { %s2182_s12 = scalar_lea.vmem %s450_s2, 16  ;;  %s2189_s29 = scalar_lea.vmem %s450_s2, 32 }
 0x106   : > { %p2183_p5 = scmp.ne.s32.totalorder %s450_s2, %s2182_s12  ;;  %p2190_p4 = scmp.lt.s32.totalorder %s450_s2, %s450_s2 }
 0x107   : > { %p2191_p10 = scmp.lt.s32.totalorder %s2189_s29, %s2182_s12 }
 0x108   : > { %p2185_p7 = pnand %p2183_p5, %p2494_p8 }
 0x109   : > { %p2192_p11 = por %p2191_p10, %p2190_p4 }
 0x10a   : > { %p2186_p9 = pneg %p2185_p7 }
 0x10c   : > { %p2193_p12 = pnand %p2192_p11, %p2186_p9 }
 0x10e   : > { %2196 = shalt.err (!%p2193_p12)
}
 0x10f   : > { %1805 = dma.hbm_to_vmem [thread:$0]  (!%p2478_p6), %s3004_s11, 16, %s450_s2, [#allocation21]  }
 0x110   : > { %s1562_s25 = sadd.s32 4294967294, %s2351_s24   ;;  %s2703_s13 = sadd.s32 1, %s2351_s24  }
 0x111   : > { %s40_s28 = ssub.s32 %s2351_s24, %s2703_s13  ;;  %s43_s26 = sadd.s32 1, %s2347_s23 }
 0x112   : > { %p41_p8 = scmp.eq.s32.totalorder %s40_s28, 0  ;;  %p50_p13 = scmp.ne.s32.totalorder %s2347_s23, %s2343_s22 }
 0x113   : > { %p51_p0 = scmp.eq.s32.totalorder %s2351_s24, 0  ;;  %p56_p1 = scmp.ne.s32.totalorder %s2343_s22, %s2339_s21 }
 0x114   : > { %s2714_s16 = scalar_select %p41_p8, %s2347_s23, %s43_s26  }
 0x115   : > { %p2716_p3 = por %p51_p0, %p50_p13  ;;  %p3035_p2 = scmp.eq.s32.totalorder %s2462_s27, 0 }
 0x116   : > { %p316_p5 = scmp.eq.s32.totalorder %s2462_s27, 1  ;;  %p322_p7 = scmp.eq.s32.totalorder %s1562_s25, 1 }
 0x117   : > { %p2722_p6 = por %p3035_p2, %p56_p1  ;;  %p1827_p9 = scmp.lt.s32.totalorder %s2351_s24, 2 }
 0x118   : > { %s2729_s14 = sand.u32 1, %s2347_s23   ;;  %p2731_p4 = por %p316_p5, %p50_p13 }
 0x119   : > { %s3036_s2 = scalar_select %p2722_p6, 1, 0 }
 0x11a   : > { %s3037_s30 = scalar_select %p2731_p4, 1, 0 }
 0x11b   : > { %p2735_p10 = por %p322_p7, %p56_p1  ;;  %s1575_s15 = sshll.u32 %s2729_s14, 3 }
 0x11c   : > { %s1576_s19 = sshll.u32 %s2351_s24, 7  ;;  %s3039_s29 = sld [smem:[#allocation33_spill]] }
 0x11d   : > { %s3038_s0 = scalar_select %p2735_p10, 1, 0 }
 0x11e   : > { %s464_s18 = scalar_lea.vmem [#allocation2], %s1575_s15  ;;  %p2750_p11 = pnand %p1827_p9, %p2716_p3 }
 0x11f   : > { %s471_s25 = sshll.u32 %s464_s18, 4  ;;  %s461_s3 = scalar_lea.sflag [#allocation3], %s2729_s14  ;;  %s2746_s25 = int_to_ptr.vmem [resolvable:$true] %s471_s25 }
 0x120   : > { %p2199_p8 = pneg %p2750_p11 }
 0x122   : > { %s2744_s17 = scalar_lea.hbm %s3039_s29, %s1576_s19  ;;  %s2202_s20 = scalar_lea.hbm %s3039_s29, 256 }
 0x123   : > { %s2197_s1 = scalar_lea.hbm %s2744_s17, 128  ;;  %p2203_p1 = scmp.lt.u32.totalorder %s2744_s17, %s3039_s29 }
 0x124   : > { %p2198_p12 = scmp.ne.s32.totalorder %s2744_s17, %s2197_s1  ;;  %p2204_p3 = scmp.lt.u32.totalorder %s2202_s20, %s2197_s1 }
 0x125   : > { %p2206_p5 = scmp.lt.u32.totalorder %s2197_s1, %s2744_s17 }
 0x126   : > { %p2200_p13 = pnand %p2199_p8, %p2198_p12  ;;  %p2205_p2 = por %p2204_p3, %p2203_p1 }
 0x128   : > { %p2201_p0 = pneg %p2200_p13  ;;  %p2207_p7 = por %p2206_p5, %p2205_p2 }
 0x12a   : > { %p2208_p9 = pnand %p2207_p7, %p2201_p0 }
 0x12c   : > { %2211 = shalt.err (!%p2208_p9)
}
 0x12d   : > { %s2212_s26 = scalar_lea.vmem %s2746_s25, 128  ;;  %s2365_s15 = smov [#allocation2]  }
 0x12e   : > { %p2213_p12 = scmp.ne.s32.totalorder %s2746_s25, %s2212_s26  ;;  %s2217_s19 = sshll.u32 %s2365_s15, 4  ;;  %s2218_s19 = int_to_ptr.vmem [resolvable:$false] %s2217_s19 }
 0x12f   : > { %s2219_s12 = scalar_lea.vmem %s2218_s19, 256  ;;  %p2220_p4 = scmp.lt.s32.totalorder %s2746_s25, %s2218_s19 }
 0x130   : > { %p2215_p13 = pnand %p2213_p12, %p2199_p8  ;;  %p2221_p1 = scmp.lt.s32.totalorder %s2219_s12, %s2212_s26 }
 0x132   : > { %p2216_p10 = pneg %p2215_p13  ;;  %p2222_p3 = por %p2221_p1, %p2220_p4 }
 0x134   : > { %p2223_p2 = pnand %p2222_p3, %p2216_p10 }
 0x136   : > { %2226 = shalt.err (!%p2223_p2)
}
 0x137   : > { %1809 = dma.hbm_to_vmem [thread:$0]  (!%p2750_p11), %s2744_s17, 128, %s2746_s25, %s461_s3  }
 0x138   : > { %s1577_s1 = sshll.u32 %s2351_s24, 4  ;;  %s481_s20 = scalar_lea.vmem [#allocation5], %s2729_s14 }
 0x139   : > { %s488_s18 = sshll.u32 %s481_s20, 4  ;;  %s3041_s5 = sld [smem:[#allocation34_spill]]  ;;  %s489_s18 = int_to_ptr.vmem [resolvable:$true] %s488_s18 }
 0x13a   : > { %s3042_s26 = sand.u32 1, %s2351_s24  }
 0x13b   : > { %s479_s12 = scalar_lea.sflag [#allocation6], %s3042_s26 }
 0x13f   : > { %s2786_s19 = scalar_lea.hbm %s3041_s5, %s1577_s1  ;;  %s2232_s17 = scalar_lea.hbm %s3041_s5, 32 }
 0x140   : > { %s2227_s6 = scalar_lea.hbm %s2786_s19, 16  ;;  %p2233_p5 = scmp.lt.u32.totalorder %s2786_s19, %s3041_s5 }
 0x141   : > { %p2228_p4 = scmp.ne.s32.totalorder %s2786_s19, %s2227_s6  ;;  %p2234_p7 = scmp.lt.u32.totalorder %s2232_s17, %s2227_s6 }
 0x142   : > { %p2236_p12 = scmp.lt.u32.totalorder %s2227_s6, %s2786_s19 }
 0x143   : > { %p2230_p10 = pnand %p2228_p4, %p2199_p8  ;;  %p2235_p9 = por %p2234_p7, %p2233_p5 }
 0x145   : > { %p2231_p0 = pneg %p2230_p10  ;;  %p2237_p13 = por %p2236_p12, %p2235_p9 }
 0x147   : > { %p2238_p1 = pnand %p2237_p13, %p2231_p0 }
 0x149   : > { %2241 = shalt.err (!%p2238_p1)
}
 0x14a   : > { %s2242_s1 = scalar_lea.vmem %s489_s18, 16  ;;  %s2366_s20 = smov [#allocation5]  }
 0x14b   : > { %p2243_p3 = scmp.ne.s32.totalorder %s489_s18, %s2242_s1  ;;  %s2247_s15 = sshll.u32 %s2366_s20, 4  ;;  %s2248_s15 = int_to_ptr.vmem [resolvable:$false] %s2247_s15 }
 0x14c   : > { %s2249_s26 = scalar_lea.vmem %s2248_s15, 32  ;;  %p2250_p10 = scmp.lt.s32.totalorder %s489_s18, %s2248_s15 }
 0x14d   : > { %p2245_p2 = pnand %p2243_p3, %p2199_p8  ;;  %p2251_p6 = scmp.lt.s32.totalorder %s2249_s26, %s2242_s1 }
 0x14f   : > { %p2246_p4 = pneg %p2245_p2  ;;  %p2252_p5 = por %p2251_p6, %p2250_p10 }
 0x151   : > { %p2253_p7 = pnand %p2252_p5, %p2246_p4 }
 0x153   : > { %2256 = shalt.err (!%p2253_p7)
}
 0x154   : > { %1812 = dma.hbm_to_vmem [thread:$0]  (!%p2750_p11), %s2786_s19, 16, %s489_s18, %s479_s12  }
 0x155   : > { %s3043_s6 = sld [smem:[#allocation32_spill]] }
 0x15b   : > { %p3044_p0 = scmp.ne.s32.totalorder %s3043_s6, 0 }
 0x15c   : > { %s2812_s3 = sand.u32 (!%p3044_p0), 1, %s2343_s22   ;;  %p3045_p6 = scmp.ne.s32.totalorder (!%p3044_p0), %s3036_s2, 0 }
 0x15d   : > { %497 = sbr.rel (%p3044_p0) target bundleno = 1993 (0x7c9), region = 68  ;;  %s1579_s14 = sshll.u32 (!%p3044_p0), %s2812_s3, 3 }
 0x15e   : > { %s500_s17 = scalar_lea.sflag (!%p3044_p0), [#allocation3], %s2812_s3  ;;  %s2818_s4 = scalar_lea.vmem (!%p3044_p0), [#allocation2], %s1579_s14 }
 0x164   : > { %2302 = dma.done.wait (%p3045_p6), %s500_s17, 128  }
 0x165   : > { %2304 = vsyncadd (%p3045_p6), %s500_s17, 4294967168  ;;  %s508_s28 = sand.u32 1, %s2462_s27   ;;  %s511_s19 = scalar_lea.vmem [#allocation5], %s2812_s3 }
 0x166   : > { %s509_s18 = scalar_lea.sflag [#allocation6], %s508_s28 }
 0x167   : > { %2306 = dma.done.wait (%p3045_p6), %s509_s18, 16  }
 0x168   : > { %2308 = vsyncadd (%p3045_p6), %s509_s18, 4294967280  ;;  %p3046_p11 = scmp.eq.s32.totalorder %s2462_s27, 0 }
 0x16a   : > { %2310 = dma.done.wait (%p3046_p11), [#allocation6], 256   ;;  %p3047_p8 = pmov %p3046_p11 }
 0x16c   : > { %2312 = vsyncadd (%p3047_p8), [#allocation6], 4294967040  ;;  %p3048_p9 = pmov %p3047_p8 }
 0x16d   : > { %p3049_p12 = pmov %p3047_p8 }
 0x16e   : > { %2314 = dma.done.wait (%p3048_p9), [#allocation9], 272  }
 0x16f   : > { %2316 = vsyncadd (%p3049_p12), [#allocation9], 4294967024  ;;  %p3050_p13 = pmov %p3047_p8 }
 0x170   : > { %p3051_p1 = pmov %p3047_p8 }
 0x171   : > { %2318 = dma.done.wait (%p3050_p13), [#allocation12], 272  }
 0x172   : > { %2320 = vsyncadd (%p3051_p1), [#allocation12], 4294967024  ;;  %p3052_p3 = pmov %p3051_p1 }
 0x173   : > { %p3053_p2 = pmov %p3051_p1 }
 0x174   : > { %2322 = dma.done.wait (%p3052_p3), [#allocation15], 272  }
 0x175   : > { %2324 = vsyncadd (%p3053_p2), [#allocation15], 4294967024  ;;  %p3054_p4 = pmov %p3051_p1 }
 0x176   : > { %p3055_p10 = pmov %p3051_p1 }
 0x177   : > { %2326 = dma.done.wait (%p3054_p4), [#allocation18], 32  }
 0x178   : > { %2328 = vsyncadd (%p3055_p10), [#allocation18], 4294967264  ;;  %p3056_p5 = pmov %p3051_p1 }
 0x179   : > { %p3057_p7 = pmov %p3051_p1 }
 0x17a   : > { %2330 = dma.done.wait (%p3056_p5), [#allocation21], 16  }
 0x17b   : > { %2332 = vsyncadd (%p3057_p7), [#allocation21], 4294967280  ;;  %v2367_v0 = vmov 0.0   ;;  %vm2368_vm0 = vmmov 0   ;;  %v1891_v1 = vld [vmem:[#allocation10] sm:$0xff]   ;;  %v1892_v2 = vld [vmem:[#allocation7] sm:$0xff]   ;;  %v800_v34 = vlaneseq }
 0x17c   : > { %1657 = vmatprep.subr.bf16.mxu1 %v2367_v0  ;;  %1649 = vmatprep.subr.bf16.mxu0 %v2367_v0  ;;  %v1893_v3 = vld [vmem:[#allocation10 + $0x8] sm:$0xff]   ;;  %v1894_v4 = vld [vmem:[#allocation7 + $0x8] sm:$0xff]   ;;  %vm622_vm1 = vcmask 261120   ;;  %v1595_v7 = vld [vmem:[#allocation11] ss:$0 sm:$0xff]  ;;  %vm805_vm2 = vcmask 64512  }
 0x17d   : > { %1661 = vmatprep.mubr.msk.bf16.mxu1 %vm2368_vm0, %v2367_v0  ;;  %1653 = vmatprep.mubr.msk.bf16.mxu0 %vm2368_vm0, %v2367_v0  ;;  %v2863_v5 = vld [vmem:[%s2818_s4] sm:$0xff]  ;;  %s2369_s2 = smov 112   ;;  %s2370_s12 = smov 120   ;;  %v1895_v23 = vld [vmem:[#allocation13] sm:$0xff]   ;;  %v801_v37 = vshrl.u32 %v800_v34, 7  ;;  %vm866_vm3 = vcmask 1043456  }
 0x17e   : > { %1658 = vmatpush3.bf16.msra.mxu1 %v1891_v1  ;;  %1650 = vmatpush3.bf16.msra.mxu0 %v1892_v2  ;;  %v598_v6 = vpack.c.bf16 %v2863_v5, %v2863_v5  ;;  %v1591_v8 = vld [vmem:[#allocation8] ss:$0 sm:$0xff]  ;;  %s2371_s25 = smov 104   ;;  %v796_v35 = vld [vmem:[%s511_s19] sm:$0x1]  ;;  %s2372_s1 = smov 8  }
 0x17f   : > { %1659 = vmatprep.subr.bf16.mxu1 %v2367_v0  ;;  %1651 = vmatprep.subr.bf16.mxu0 %v2367_v0  ;;  %v1896_v24 = vld [vmem:[#allocation13 + $0x8] sm:$0xff]   ;;  %v797_v36 = vsub.f32 1.0, %v796_v35  ;;  %v802_v39 = vsub.s32 0, %v801_v37  ;;  %v1599_v47 = vld [vmem:[#allocation14] ss:$0 sm:$0xff]  ;;  %s2373_s20 = smov 16  }
 0x180   : > { %s2374_s15 = smov 24   ;;  %vm1260_vm4 = vcmask 130048   ;;  %vm1263_vm5 = vcmask 195584   ;;  %s1618_s26 = sshll.u32 %s2462_s27, 7 }
 0x181   : > { %v798_v38 = vmul.f32 -10000.0, %v797_v36  ;;  %s595_s6 = scalar_lea.vmem [#allocation22], %s1579_s14  ;;  %s3058_s18 = sld [smem:[#allocation40_spill]] }
 0x182   : > { %1660 = vmatpush3.bf16.msra.mxu1 %v1893_v3  ;;  %1652 = vmatpush3.bf16.msra.mxu0 %v1894_v4  ;;  %s1377_s17 = sshll.u32 %s595_s6, 4  ;;  %p3059_p6 = scmp.ne.s32.totalorder %s3037_s30, 0  ;;  %s2950_s17 = int_to_ptr.vmem [resolvable:$true] %s1377_s17 }
 0x183   : > { %1673 = vmatprep.subr.bf16.mxu1 %v2367_v0  ;;  %1665 = vmatprep.subr.bf16.mxu0 %v2367_v0  ;;  %v803_v40 = vrot.slane %v798_v38, %v802_v39  ;;  %s2375_s27 = smov [#allocation22]  }
 0x184   : > { %s2261_s14 = sshll.u32 %s2375_s27, 4  ;;  %s2262_s14 = int_to_ptr.vmem [resolvable:$false] %s2261_s14 }
 0x185   : > { %1662 = vmatmul.mubr.msk.bf16.vlgmr.msra.gmra.mrb[0].mxu1 %vm622_vm1, %v598_v6  ;;  %1654 = vmatmul.mubr.msk.bf16.vlgmr.msra.gmra.mrb[0].mxu0 %vm622_vm1, %v598_v6  ;;  %p2264_p9 = scmp.lt.s32.totalorder %s2950_s17, %s2262_s14 }
 0x186   : > { %1675 = vmatprep.mubr.msk.bf16.mxu1 %vm2368_vm0, %v2367_v0  ;;  %1669 = vmatprep.mubr.msk.bf16.mxu0 %vm2368_vm0, %v2367_v0 }
 0x187   : > { %1666 = vmatpush3.bf16.msra.mxu0 %v1895_v23  ;;  %s2948_s19 = scalar_lea.hbm %s3058_s18, %s1618_s26 }
 0x188   : > { %1667 = vmatprep.subr.bf16.mxu0 %v2367_v0 }
 0x18b   : > { %1668 = vmatpush3.bf16.msra.mxu0 %v1896_v24 }
 0x18c   : > { %1679 = vmatprep.subr.bf16.mxu0 %v2367_v0 }
 0x18e   : > { %1670 = vmatmul.mubr.msk.bf16.vlgmr.msra.gmra.mrb[4].mxu0 %vm622_vm1, %v598_v6 }
 0x18f   : > { %1681 = vmatprep.mubr.msk.bf16.mxu0 %vm2368_vm0, %v2367_v0 }
 0x258   : > { %v725_v9 = vpop.f32.mrb[0].mxu1  ;;  %v660_v12 = vpop.f32.mrb[0].mxu0 }
 0x259   : > { %v726_v10 = vadd.f32 %v1595_v7, %v725_v9  ;;  %v1663_v11 = vpop.f32.mrb[1].mxu1  ;;  %v661_v13 = vadd.f32 %v1591_v8, %v660_v12  ;;  %v1655_v15 = vpop.f32.mrb[1].mxu0 }
 0x25a   : > { %v728_v14 = vpop.f32.mrb[2].mxu1  ;;  %v663_v18 = vpop.f32.mrb[2].mxu0 }
 0x25b   : > { %v731_v16 = vpack.c.bf16 %v726_v10, %v726_v10  ;;  %v1664_v17 = vpop.f32.mrb[3].mxu1  ;;  %v666_v19 = vmul.f32 0.35355338, %v661_v13  ;;  %v1656_v20 = vpop.f32.mrb[3].mxu0 }
 0x25d   : > { %1028 = vrot.lane.b32.xlu1 %v731_v16, %s2369_s2  ;;  %916 = vrot.lane.b32.xlu0 %v731_v16, %s2370_s12  ;;  %v810_v21 = vsel %vm805_vm2, %v731_v16, 0  ;;  %v667_v22 = vpack.c.bf16 %v666_v19, %v666_v19 }
 0x25e   : > { %1674 = vmatpush3.bf16.xpose.msra.mxu1 %v810_v21 }
 0x25f   : > { %1685 = vmatprep.subr.bf16.mxu1 %v2367_v0 }
 0x261   : > { %1026 = vrot.lane.b32.xlu1 %v667_v22, %s2369_s2  ;;  %913 = vrot.lane.b32.xlu0 %v667_v22, %s2370_s12  ;;  %v789_v48 = vpop.f32.mrb[4].mxu0 }
 0x262   : > { %v790_v49 = vadd.f32 %v1599_v47, %v789_v48  ;;  %v1671_v50 = vpop.f32.mrb[5].mxu0 }
 0x263   : > { %v792_v51 = vpop.f32.mrb[6].mxu0 }
 0x264   : > { %v1672_v52 = vpop.f32.mrb[7].mxu0  ;;  %v795_v53 = vpack.c.bf16 %v790_v49, %v790_v49  ;;  %v1897_v49 = vld [vmem:[#allocation16] sm:$0xff]  }
 0x265   : > { %1137 = vrot.lane.b32.xlu1 %v667_v22, %s2371_s25  ;;  %1139 = vrot.lane.b32.xlu0 %v731_v16, %s2371_s25 }
 0x266   : > { %1676 = vmatmul.mubr.msk.bf16.vlgmr.msra.gmra.mrb[4].mxu1 %vm805_vm2, %v667_v22  ;;  %v868_v54 = vsel %vm866_vm3, %v795_v53, 0 }
 0x267   : > { %1687 = vmatprep.mubr.msk.bf16.mxu1 %vm2368_vm0, %v2367_v0  ;;  %1680 = vmatpush3.bf16.msra.mxu0 %v868_v54 }
 0x268   : > { %1691 = vmatprep.subr.bf16.mxu0 %v2367_v0 }
 0x2cf   : > { %v917_v25 = vpop.permute.xlu0 %916  ;;  %v1029_v27 = vpop.permute.xlu1 %1028 }
 0x2d0   : > { %v922_v26 = vsel %vm805_vm2, %v917_v25, 0  ;;  %v1034_v29 = vsel %vm805_vm2, %v1029_v27, 0 }
 0x2d1   : > { %1686 = vmatpush3.bf16.xpose.msra.mxu1 %v922_v26 }
 0x2d2   : > { %1697 = vmatprep.subr.bf16.mxu1 %v2367_v0 }
 0x2d3   : > { %v914_v28 = vpop.permute.xlu0 %913  ;;  %v1027_v31 = vpop.permute.xlu1 %1026 }
 0x2d7   : > { %v1140_v30 = vpop.permute.xlu0 %1139  ;;  %v1138_v33 = vpop.permute.xlu1 %1137 }
 0x2d8   : > { %1688 = vmatmul.mubr.msk.bf16.vlgmr.msra.gmra.mrb[8].mxu1 %vm805_vm2, %v914_v28  ;;  %v1145_v32 = vsel %vm805_vm2, %v1140_v30, 0 }
 0x2d9   : > { %1698 = vmatpush3.bf16.xpose.msra.mxu1 %v1034_v29  ;;  %1699 = vmatprep.mubr.msk.bf16.mxu1 %vm2368_vm0, %v2367_v0 }
 0x2da   : > { %1709 = vmatprep.subr.bf16.mxu1 %v2367_v0 }
 0x2e0   : > { %1700 = vmatmul.mubr.msk.bf16.vlgmr.msra.gmra.mrb[12].mxu1 %vm805_vm2, %v1027_v31 }
 0x2e1   : > { %1710 = vmatpush3.bf16.xpose.msra.mxu1 %v1145_v32  ;;  %1711 = vmatprep.mubr.msk.bf16.mxu1 %vm2368_vm0, %v2367_v0 }
 0x2e2   : > { %1721 = vmatprep.subr.bf16.mxu1 %v2367_v0 }
 0x2e8   : > { %1712 = vmatmul.mubr.msk.bf16.vlgmr.msra.gmra.mrb[16].mxu1 %vm805_vm2, %v1138_v33 }
 0x2e9   : > { %1725 = vmatprep.mubr.msk.bf16.mxu1 %vm2368_vm0, %v2367_v0  ;;  %1722 = vmatpush3.bf16.msra.mxu1 %v1897_v49 }
 0x2ea   : > { %1723 = vmatprep.subr.bf16.mxu1 %v2367_v0 }
 0x339   : > { %v846_v41 = vpop.f32.mrb[4].mxu1 }
 0x33a   : > { %v847_v42 = vadd.f32 %v846_v41, %v803_v40  ;;  %v1677_v43 = vpop.f32.mrb[5].mxu1 }
 0x33b   : > { %v849_v44 = vpop.f32.mrb[6].mxu1 }
 0x33c   : > { %v1678_v45 = vpop.f32.mrb[7].mxu1  ;;  %v852_v46 = vsel %vm805_vm2, %v847_v42, -inf }
 0x33d   : > { %853 = vmax.xlane.f32.xlu0 %v852_v46 }
 0x3ab   : > { %v958_v55 = vpop.f32.mrb[8].mxu1 }
 0x3ac   : > { %v959_v56 = vadd.f32 %v958_v55, %v803_v40  ;;  %v1689_v57 = vpop.f32.mrb[9].mxu1 }
 0x3ad   : > { %v961_v58 = vpop.f32.mrb[10].mxu1 }
 0x3ae   : > { %v1690_v59 = vpop.f32.mrb[11].mxu1  ;;  %v964_v60 = vsel %vm805_vm2, %v959_v56, -inf }
 0x3af   : > { %965 = vmax.xlane.f32.xlu1 %v964_v60 }
 0x3b3   : > { %v1070_v61 = vpop.f32.mrb[12].mxu1 }
 0x3b4   : > { %v1071_v62 = vadd.f32 %v1070_v61, %v803_v40  ;;  %v1701_v63 = vpop.f32.mrb[13].mxu1 }
 0x3b5   : > { %v1073_v1 = vpop.f32.mrb[14].mxu1 }
 0x3b6   : > { %v1702_v2 = vpop.f32.mrb[15].mxu1  ;;  %v1076_v3 = vsel %vm805_vm2, %v1071_v62, -inf }
 0x3b7   : > { %1077 = vmax.xlane.f32.xlu0 %v1076_v3 }
 0x3bb   : > { %v1181_v4 = vpop.f32.mrb[16].mxu1 }
 0x3bc   : > { %v1182_v6 = vadd.f32 %v1181_v4, %v803_v40  ;;  %v1713_v7 = vpop.f32.mrb[17].mxu1 }
 0x3bd   : > { %v1184_v8 = vpop.f32.mrb[18].mxu1 }
 0x3be   : > { %v1714_v9 = vpop.f32.mrb[19].mxu1  ;;  %v1187_v10 = vsel %vm805_vm2, %v1182_v6, -inf }
 0x3bf   : > { %1188 = vmax.xlane.f32.xlu0 %v1187_v10 }
 0x3c0   : > { %976 = vrot.lane.b32.xlu1 %v795_v53, %s2370_s12  ;;  %s2257_s12 = scalar_lea.vmem %s2950_s17, 128 }
 0x3c1   : > { %p2258_p0 = scmp.ne.s32.totalorder %s2950_s17, %s2257_s12 }
 0x3c3   : > { %p2259_p11 = pnand %p2258_p0, %p3059_p6 }
 0x3c4   : > { %1198 = vrot.lane.b32.xlu1 %v795_v53, %s2371_s25  ;;  %s2263_s25 = scalar_lea.vmem %s2262_s14, 256 }
 0x3c5   : > { %p2260_p8 = pneg %p2259_p11  ;;  %p2265_p12 = scmp.lt.s32.totalorder %s2263_s25, %s2257_s12 }
 0x3c7   : > { %p2266_p13 = por %p2265_p12, %p2264_p9 }
 0x3c9   : > { %p2267_p1 = pnand %p2266_p13, %p2260_p8 }
 0x3ca   : > { %v854_v11 = vpop.xlane.xlu0 %853 }
 0x3cb   : > { %v855_v12 = vsub.f32 %v847_v42, %v854_v11 }
 0x3cd   : > { %v856_v13 = vmul.f32 1.442695, %v855_v12 }
 0x3cf   : > { %1899 = vpow2.f32 %v856_v13 }
 0x3d5   : > { %1087 = vrot.lane.b32.xlu0 %v795_v53, %s2369_s2  ;;  %v1898_v53 = vld [vmem:[#allocation16 + $0x8] sm:$0xff]   ;;  %s1364_s2 = scalar_lea.sflag [#allocation4], %s2812_s3 }
 0x3d6   : > { %1724 = vmatpush3.bf16.msra.mxu1 %v1898_v53 }
 0x3d9   : > { %v1900_v14 = vpop.eup %1899 }
 0x3da   : > { %v862_v15 = vpack.c.bf16 %v1900_v14, %v1900_v14  ;;  %v858_v31 = vsel %vm805_vm2, %v1900_v14, 0.0 }
 0x3dc   : > { %1682 = vmatmul.mubr.msk.bf16.vlgmr.msra.gmra.mrb[8].mxu0 %vm805_vm2, %v862_v15 }
 0x3dd   : > { %1693 = vmatprep.mubr.msk.bf16.mxu0 %vm2368_vm0, %v2367_v0 }
 0x43c   : > { %v966_v16 = vpop.xlane.xlu1 %965 }
 0x43d   : > { %v967_v17 = vsub.f32 %v959_v56, %v966_v16 }
 0x43f   : > { %v968_v18 = vmul.f32 1.442695, %v967_v17 }
 0x440   : > { %v977_v19 = vpop.permute.xlu1 %976 }
 0x441   : > { %1901 = vpow2.f32 %v968_v18  ;;  %v982_v20 = vsel %vm866_vm3, %v977_v19, 0  ;;  %v1611_v18 = vld [vmem:[#allocation17] ss:$0 sm:$0xff] }
 0x442   : > { %1692 = vmatpush3.bf16.msra.mxu0 %v982_v20 }
 0x443   : > { %1703 = vmatprep.subr.bf16.mxu0 %v2367_v0 }
 0x444   : > { %v1078_v21 = vpop.xlane.xlu0 %1077  ;;  %v1199_v34 = vpop.permute.xlu1 %1198 }
 0x445   : > { %v1079_v22 = vsub.f32 %v1071_v62, %v1078_v21  ;;  %v1204_v37 = vsel %vm866_vm3, %v1199_v34, 0 }
 0x447   : > { %v1080_v23 = vmul.f32 1.442695, %v1079_v22 }
 0x449   : > { %1903 = vpow2.f32 %v1080_v23 }
 0x44b   : > { %v1902_v24 = vpop.eup %1901 }
 0x44c   : > { %v1189_v25 = vpop.xlane.xlu0 %1188  ;;  %v970_v26 = vsel %vm805_vm2, %v1902_v24, 0.0  ;;  %v974_v27 = vpack.c.bf16 %v1902_v24, %v1902_v24 }
 0x44d   : > { %v1190_v28 = vsub.f32 %v1182_v6, %v1189_v25  ;;  %971 = vadd.xlane.f32.xlu1 %v970_v26 }
 0x44e   : > { %1694 = vmatmul.mubr.msk.bf16.vlgmr.msra.gmra.mrb[12].mxu0 %vm805_vm2, %v974_v27 }
 0x44f   : > { %v1191_v29 = vmul.f32 1.442695, %v1190_v28  ;;  %1705 = vmatprep.mubr.msk.bf16.mxu0 %vm2368_vm0, %v2367_v0 }
 0x450   : > { %v1088_v30 = vpop.permute.xlu0 %1087 }
 0x451   : > { %1905 = vpow2.f32 %v1191_v29  ;;  %v1093_v32 = vsel %vm866_vm3, %v1088_v30, 0  ;;  %859 = vadd.xlane.f32.xlu1 %v858_v31 }
 0x452   : > { %1704 = vmatpush3.bf16.msra.mxu0 %v1093_v32 }
 0x453   : > { %v1904_v33 = vpop.eup %1903  ;;  %1715 = vmatprep.subr.bf16.mxu0 %v2367_v0 }
 0x454   : > { %v1082_v35 = vsel %vm805_vm2, %v1904_v33, 0.0  ;;  %v1086_v36 = vpack.c.bf16 %v1904_v33, %v1904_v33 }
 0x455   : > { %1083 = vadd.xlane.f32.xlu0 %v1082_v35 }
 0x456   : > { %1706 = vmatmul.mubr.msk.bf16.vlgmr.msra.gmra.mrb[16].mxu0 %vm805_vm2, %v1086_v36  ;;  %v1616_v36 = vld [vmem:[#allocation20] ss:$0 sm:$0xff] }
 0x457   : > { %1716 = vmatpush3.bf16.msra.mxu0 %v1204_v37  ;;  %1717 = vmatprep.mubr.msk.bf16.mxu0 %vm2368_vm0, %v2367_v0 }
 0x45b   : > { %v1906_v38 = vpop.eup %1905 }
 0x45c   : > { %v1193_v39 = vsel %vm805_vm2, %v1906_v38, 0.0  ;;  %v1197_v40 = vpack.c.bf16 %v1906_v38, %v1906_v38 }
 0x45d   : > { %1194 = vadd.xlane.f32.xlu0 %v1193_v39 }
 0x45e   : > { %1718 = vmatmul.mubr.msk.bf16.vlgmr.msra.gmra.mrb[20].mxu0 %vm805_vm2, %v1197_v40 }
 0x4af   : > { %v904_v41 = vpop.f32.mrb[8].mxu0 }
 0x4b0   : > { %v1683_v42 = vpop.f32.mrb[9].mxu0 }
 0x4b1   : > { %v907_v43 = vpop.f32.mrb[10].mxu0 }
 0x4b2   : > { %v1684_v44 = vpop.f32.mrb[11].mxu0 }
 0x4da   : > { %v972_v45 = vpop.xlane.xlu1 %971 }
 0x4db   : > { %1907 = vrcp.f32 %v972_v45 }
 0x4de   : > { %v860_v8 = vpop.xlane.xlu1 %859 }
 0x4e2   : > { %v1084_v46 = vpop.xlane.xlu0 %1083 }
 0x4e3   : > { %1909 = vrcp.f32 %v1084_v46 }
 0x4e5   : > { %v1908_v47 = vpop.eup %1907 }
 0x4ea   : > { %v1195_v54 = vpop.xlane.xlu0 %1194 }
 0x4eb   : > { %1911 = vrcp.f32 %v1195_v54 }
 0x4ec   : > { %1913 = vrcp.f32 %v860_v8 }
 0x4ed   : > { %v1910_v57 = vpop.eup %1909 }
 0x4f5   : > { %v1912_v1 = vpop.eup %1911 }
 0x4f6   : > { %v1914_v9 = vpop.eup %1913 }
 0x4f7   : > { %v910_v10 = vmul.f32 %v1914_v9, %v904_v41 }
 0x4f9   : > { %v911_v13 = vpack.c.bf16 %v910_v10, %v910_v10 }
 0x521   : > { %v1018_v48 = vpop.f32.mrb[12].mxu0 }
 0x522   : > { %v1024_v50 = vmul.f32 %v1908_v47, %v1018_v48  ;;  %v1695_v51 = vpop.f32.mrb[13].mxu0 }
 0x523   : > { %v1021_v52 = vpop.f32.mrb[14].mxu0 }
 0x524   : > { %v1025_v55 = vpack.c.bf16 %v1024_v50, %v1024_v50  ;;  %v1696_v56 = vpop.f32.mrb[15].mxu0 }
 0x526   : > { %1249 = vrot.lane.b32.xlu0 %v1025_v55, %s2372_s1 }
 0x529   : > { %v1129_v58 = vpop.f32.mrb[16].mxu0 }
 0x52a   : > { %v1135_v59 = vmul.f32 %v1910_v57, %v1129_v58  ;;  %v1707_v60 = vpop.f32.mrb[17].mxu0 }
 0x52b   : > { %v1132_v61 = vpop.f32.mrb[18].mxu0 }
 0x52c   : > { %v1136_v62 = vpack.c.bf16 %v1135_v59, %v1135_v59  ;;  %v1708_v63 = vpop.f32.mrb[19].mxu0 }
 0x52e   : > { %1252 = vrot.lane.b32.xlu1 %v1136_v62, %s2373_s20 }
 0x531   : > { %v1240_v2 = vpop.f32.mrb[20].mxu0 }
 0x532   : > { %v1246_v3 = vmul.f32 %v1912_v1, %v1240_v2  ;;  %v1719_v4 = vpop.f32.mrb[21].mxu0 }
 0x533   : > { %v1243_v6 = vpop.f32.mrb[22].mxu0 }
 0x534   : > { %v1247_v7 = vpack.c.bf16 %v1246_v3, %v1246_v3  ;;  %v1720_v0 = vpop.f32.mrb[23].mxu0 }
 0x536   : > { %1255 = vrot.lane.b32.xlu1 %v1247_v7, %s2374_s15 }
 0x598   : > { %v1250_v11 = vpop.permute.xlu0 %1249 }
 0x599   : > { %v1259_v14 = vsel %vm805_vm2, %v911_v13, %v1250_v11 }
 0x5a0   : > { %v1253_v12 = vpop.permute.xlu1 %1252 }
 0x5a1   : > { %v1262_v15 = vsel %vm1260_vm4, %v1259_v14, %v1253_v12 }
 0x5a8   : > { %v1256_v16 = vpop.permute.xlu1 %1255 }
 0x5a9   : > { %v1265_v17 = vsel %vm1263_vm5, %v1262_v15, %v1256_v16 }
 0x5aa   : > { %1726 = vmatmul.mubr.msk.bf16.vlgmr.msra.gmra.mrb[20].mxu1 %vm622_vm1, %v1265_v17 }
 0x67d   : > { %v1325_v19 = vpop.f32.mrb[20].mxu1 }
 0x67e   : > { %v1326_v20 = vadd.f32 %v1611_v18, %v1325_v19  ;;  %v1727_v21 = vpop.f32.mrb[21].mxu1 }
 0x67f   : > { %v1328_v22 = vpop.f32.mrb[22].mxu1 }
 0x680   : > { %v1728_v23 = vpop.f32.mrb[23].mxu1  ;;  %v1331_v24 = vadd.f32 %v1326_v20, %v2863_v5  ;;  %v1615_v5 = vld [vmem:[#allocation19] ss:$0 sm:$0xff] }
 0x682   : > { %v1332_v25 = vsel %vm622_vm1, %v1331_v24, 0.0 }
 0x683   : > { %1333 = vadd.xlane.f32.xlu0 %v1332_v25 }
 0x710   : > { %v1334_v26 = vpop.xlane.xlu0 %1333 }
 0x711   : > { %v1336_v27 = vmul.f32 0.03125, %v1334_v26 }
 0x713   : > { %v1337_v28 = vsub.f32 %v1331_v24, %v1336_v27 }
 0x715   : > { %v1338_v29 = vmul.f32 %v1337_v28, %v1337_v28 }
 0x717   : > { %v1339_v30 = vsel %vm622_vm1, %v1338_v29, 0.0 }
 0x718   : > { %1340 = vadd.xlane.f32.xlu1 %v1339_v30 }
 0x7a5   : > { %v1341_v31 = vpop.xlane.xlu1 %1340 }
 0x7a6   : > { %v1342_v32 = vmul.f32 0.03125, %v1341_v31 }
 0x7a8   : > { %v1343_v33 = vadd.f32 1e-12, %v1342_v32 }
 0x7aa   : > { %1915 = vrsqrt.f32 %v1343_v33 }
 0x7b4   : > { %v1916_v34 = vpop.eup %1915 }
 0x7b5   : > { %v1345_v35 = vmul.f32 %v1916_v34, %v1337_v28 }
 0x7b7   : > { %v1353_v37 = vmul.f32 %v1615_v5, %v1345_v35 }
 0x7b9   : > { %v1361_v38 = vadd.f32 %v1616_v36, %v1353_v37 }
 0x7bb   : > { %1362 = vst.msk [vmem:[%s595_s6] sm:$0xff] %vm622_vm1, %v1361_v38 }
 0x7bc   : > { %2270 = shalt.err (!%p2267_p1)
}
 0x7bd   : > { %s2271_s3 = scalar_lea.hbm %s2948_s19, 128  ;;  %s2275_s15 = scalar_lea.hbm %s3058_s18, 256 }
 0x7be   : > { %p2272_p3 = scmp.ne.s32.totalorder %s2948_s19, %s2271_s3  ;;  %p2276_p10 = scmp.lt.u32.totalorder %s2948_s19, %s3058_s18 }
 0x7bf   : > { %p2277_p5 = scmp.lt.u32.totalorder %s2275_s15, %s2271_s3  ;;  %p2279_p0 = scmp.lt.u32.totalorder %s2271_s3, %s2948_s19 }
 0x7c0   : > { %p2273_p2 = pnand %p2272_p3, %p3059_p6 }
 0x7c1   : > { %p2278_p7 = por %p2277_p5, %p2276_p10 }
 0x7c2   : > { %p2274_p4 = pneg %p2273_p2 }
 0x7c3   : > { %p2280_p11 = por %p2279_p0, %p2278_p7 }
 0x7c5   : > { %p2281_p8 = pnand %p2280_p11, %p2274_p4 }
 0x7c7   : > { %2284 = shalt.err (!%p2281_p8)
}
 0x7c8   : > { %1773 = dma.vmem_to_hbm [thread:$0]  (%p3059_p6), %s2950_s17, 128, %s2948_s19, %s1364_s2  }
 0x7c9 PF: > { %s1389_s4 = sand.u32 1, %s2339_s21   ;;  %p3060_p9 = scmp.ne.s32.totalorder %s3038_s0, 0 }
 0x7ca   : > { %p3061_p12 = scmp.ge.s32.totalorder %s2351_s24, 2  ;;  %s1390_s28 = scalar_lea.sflag [#allocation4], %s1389_s4 }
 0x7cc   : > { %p1814_p13 = pnand %p3061_p12, %p3060_p9 }
 0x7ce   : > { %2334 = dma.done.wait (!%p1814_p13), %s1390_s28, 128  }
 0x7cf   : > { %2336 = vsyncadd (!%p1814_p13), %s1390_s28, 4294967168  ;;  %p33_p1 = scmp.ge.s32.totalorder %s2703_s13, 4   ;;  %s3062_s21 = smov %s2343_s22 }
 0x7d0   : > { %s3063_s22 = smov %s2347_s23  ;;  %s3064_s23 = smov %s2714_s16 }
 0x7d1   : > { %s3065_s24 = smov %s2703_s13  ;;  %35 = sbr.rel (!%p33_p1) target bundleno = 21 (0x15), region = 166 }
 0x7d8   :  { %1395 = vsyncpa [#allocation3], 1 }
 0x7d9   :  { %1397 = vsyncpa [#allocation3 + $0x1], 1 }
 0x7da   :  { %1398 = vsyncpa [#allocation6], 1 }
 0x7db   :  { %1400 = vsyncpa [#allocation6 + $0x1], 1 }
 0x7dc   :  { %1401 = vsyncpa [#allocation9], 1 }
 0x7dd   :  { %1402 = vsyncpa [#allocation12], 1 }
 0x7de   :  { %1403 = vsyncpa [#allocation15], 1 }
 0x7df   :  { %1404 = vsyncpa [#allocation18], 1 }
 0x7e0   :  { %1405 = vsyncpa [#allocation21], 1 }
 0x7e1   :  { %1406 = vsyncpa [#allocation4], 1 }
 0x7e2   :  { %1408 = vsyncpa [#allocation4 + $0x1], 1 }

</bundles_post_ra>
